<compile_context>
chip_gen: v5e
topology: v5e:2x2
jax: 0.10.0
libtpu: 0.0.40
codegen_flags: <defaults>
</compile_context>

<pallas_src>
import math

import jax
import jax.numpy as jnp
from jax import lax
from jax.experimental import pallas as pl
from jax.experimental.pallas import tpu as pltpu


# ---------------------------------------------------------------------------
# Pass 1: masked 1-NN argmin over dino points (reduction over dino tiles).
# ---------------------------------------------------------------------------
def _knn_argmin_kernel(qa_ref, qb_ref, da_ref, db_ref, idx_ref,
                       min_ref, arg_ref):
    """Grid: (query blocks, dino blocks). Dino axis is the reduction axis.

    qa_ref: (TQ, 8) augmented query rows  [qx, qy, qz, |q|^2, 1, 0, 0, 0]
    da_ref: (8, TD) augmented dino cols   [-2dx; -2dy; -2dz; 1; |d|^2; 0; 0; 0]
    so dist = qa @ da = |q|^2 - 2 q.d + |d|^2 in a single K=8 MXU matmul.
    """
    j = pl.program_id(1)

    @pl.when(j == 0)
    def _init():
        min_ref[...] = jnp.full(min_ref.shape, jnp.inf, jnp.float32)
        arg_ref[...] = jnp.zeros(arg_ref.shape, jnp.int32)

    dist = jnp.dot(qa_ref[...], da_ref[...],
                   preferred_element_type=jnp.float32)          # (TQ, TD)

    # Mask cross-batch pairs (torch_cluster.knn batch_x / batch_y semantics).
    same_batch = qb_ref[...] == db_ref[...]                     # (TQ,1)==(1,TD)
    dist = jnp.where(same_batch, dist, jnp.inf)

    tq, td = dist.shape
    blk_min = jnp.min(dist, axis=-1, keepdims=True)             # (TQ, 1)
    # First index achieving the block minimum, entirely in int32 (no f32 iota
    # or cast); sentinel td for non-minimal lanes.
    lane = lax.broadcasted_iota(jnp.int32, (tq, td), 1)
    blk_arg = jnp.min(jnp.where(dist == blk_min, lane, td),
                      axis=-1, keepdims=True)                    # (TQ, 1) int32
    gidx = blk_arg + j * td                                      # global dino idx

    # Running min across dino blocks; earlier block wins ties (strict '<'),
    # matching a global first-argmin.  All-inf rows keep idx 0 like jnp.argmin.
    better = blk_min < min_ref[...]
    arg_ref[...] = jnp.where(better, gidx, arg_ref[...])
    min_ref[...] = jnp.minimum(min_ref[...], blk_min)

    @pl.when(j == pl.num_programs(1) - 1)
    def _finalize():
        idx_ref[...] = arg_ref[...]


# ---------------------------------------------------------------------------
# Pass 2: seg_head (nn.Linear) fused with the backbone/dino feature concat.
# Inputs (features / weights) are bf16, accumulation and bias are f32.
# ---------------------------------------------------------------------------
def _seg_head_kernel(pf_ref, gf_ref, wb_ref, wd_ref, b_ref, o_ref):
    acc = jnp.dot(pf_ref[...], wb_ref[...], preferred_element_type=jnp.float32)
    acc = acc + jnp.dot(gf_ref[...], wd_ref[...],
                        preferred_element_type=jnp.float32)
    o_ref[...] = acc + b_ref[...]


# ---------------------------------------------------------------------------
# Wrapper
# ---------------------------------------------------------------------------
def _round_up(x, m):
    return ((x + m - 1) // m) * m


def _pad_rows(x, n_target, value=0):
    n = x.shape[0]
    if n == n_target:
        return x
    pad = [(0, n_target - n)] + [(0, 0)] * (x.ndim - 1)
    return jnp.pad(x, pad, constant_values=value)


def dino_enhanced_segmentor_forward(point_feat, origin_coord, origin_batch,
                                    dino_coord, dino_feat, dino_batch,
                                    seg_w, seg_b, *, tq=512, td=2048, tq2=1024):
    """Returns seg_logits, shape (N_query, num_classes), float32.

    origin_batch / dino_batch are 1-D int per-point batch ids (offset2batch).
    tq/td are pass-1 (query, dino) tiles; tq2 is the pass-2 row tile.
    """
    nq, c_b = point_feat.shape
    nd, c_d = dino_feat.shape
    num_classes = seg_w.shape[-1]
    c_pad = max(128, _round_up(num_classes, 128))          # lane-dense output

    # Clamp tiles for small problems (keep multiples of 256 for the MXU).
    tq = min(tq, _round_up(nq, 256))
    td = min(td, _round_up(nd, 256))
    tq2 = min(tq2, _round_up(nq, 256))

    # nq_pad must be divisible by both row tiles.
    row_step = tq * tq2 // math.gcd(tq, tq2)
    nq_pad = _round_up(nq, row_step)
    nd_pad = _round_up(nd, td)

    # Pad point sets. Padded queries get batch -1, padded dino points batch -2,
    # so padded rows/cols never match anything real and never get selected.
    oc = _pad_rows(origin_coord.astype(jnp.float32), nq_pad)
    ob = _pad_rows(jnp.asarray(origin_batch, jnp.int32).reshape(-1, 1),
                   nq_pad, value=-1)                              # (NQ_pad, 1)
    pf = _pad_rows(point_feat.astype(jnp.bfloat16), nq_pad)       # pass-2 bf16
    dc = _pad_rows(dino_coord.astype(jnp.float32), nd_pad)
    db = _pad_rows(jnp.asarray(dino_batch, jnp.int32).reshape(-1, 1),
                   nd_pad, value=-2)
    db_t = db.reshape(1, nd_pad)                                  # (1, ND_pad)

    # Augmented operands so the distance expansion is one aligned K=8 matmul.
    # (Kept in f32: the expanded-distance formula needs the precision; the
    #  K=8 matmul is not the pass-1 bottleneck.)
    qn = jnp.sum(oc * oc, axis=-1, keepdims=True)
    a_aug = jnp.concatenate(
        [oc, qn, jnp.ones((nq_pad, 1), jnp.float32),
         jnp.zeros((nq_pad, 3), jnp.float32)], axis=-1)           # (NQ_pad, 8)
    dn = jnp.sum(dc * dc, axis=-1, keepdims=True)
    b_aug = jnp.concatenate(
        [-2.0 * dc, jnp.ones((nd_pad, 1), jnp.float32), dn,
         jnp.zeros((nd_pad, 3), jnp.float32)], axis=-1).T         # (8, ND_pad)

    # ---- Pass 1: 1-NN indices ---------------------------------------------
    idx2d = pl.pallas_call(
        _knn_argmin_kernel,
        out_shape=jax.ShapeDtypeStruct((nq_pad, 1), jnp.int32),
        grid_spec=pltpu.PrefetchScalarGridSpec(
            num_scalar_prefetch=0,
            grid=(nq_pad // tq, nd_pad // td),
            in_specs=[
                pl.BlockSpec((tq, 8), lambda i, j: (i, 0)),   # augmented queries
                pl.BlockSpec((tq, 1), lambda i, j: (i, 0)),   # query batch ids
                pl.BlockSpec((8, td), lambda i, j: (0, j)),   # augmented dino (pre-T)
                pl.BlockSpec((1, td), lambda i, j: (0, j)),   # dino batch ids (pre-T)
            ],
            out_specs=pl.BlockSpec((tq, 1), lambda i, j: (i, 0)),
            scratch_shapes=[pltpu.VMEM((tq, 1), jnp.float32),   # running min
                            pltpu.VMEM((tq, 1), jnp.int32)],    # running argmin
        ),
        compiler_params=pltpu.CompilerParams(
            # v7x note: with large tq and small NQ the leading 'parallel' axis
            # can collapse to a single block and idle one TC; tq is clamped to
            # the problem size above to mitigate the tiny-N case.
            dimension_semantics=("parallel", "arbitrary"),
            vmem_limit_bytes=32 * 1024 * 1024),
    )(a_aug, ob, b_aug, db_t)

    idx = idx2d[:, 0]                                             # (NQ_pad,)
    # Gather in bf16: halves the HBM write of the gathered array and the
    # pass-2 read of it.
    gathered = jnp.take(dino_feat.astype(jnp.bfloat16), idx, axis=0)

    # ---- Pass 2: fused concat + seg_head linear -----------------------------
    w_b = seg_w[:c_b].astype(jnp.bfloat16)
    w_d = seg_w[c_b:].astype(jnp.bfloat16)
    b_p = jnp.asarray(seg_b, jnp.float32).reshape(1, -1)
    if c_pad != num_classes:
        w_b = jnp.pad(w_b, ((0, 0), (0, c_pad - num_classes)))
        w_d = jnp.pad(w_d, ((0, 0), (0, c_pad - num_classes)))
        b_p = jnp.pad(b_p, ((0, 0), (0, c_pad - num_classes)))

    logits = pl.pallas_call(
        _seg_head_kernel,
        out_shape=jax.ShapeDtypeStruct((nq_pad, c_pad), jnp.float32),
        grid_spec=pltpu.PrefetchScalarGridSpec(
            num_scalar_prefetch=0,
            grid=(nq_pad // tq2,),
            in_specs=[
                pl.BlockSpec((tq2, c_b), lambda i: (i, 0)),    # backbone feat (bf16)
                pl.BlockSpec((tq2, c_d), lambda i: (i, 0)),    # gathered dino (bf16)
                pl.BlockSpec((c_b, c_pad), lambda i: (0, 0)),  # W backbone part (bf16)
                pl.BlockSpec((c_d, c_pad), lambda i: (0, 0)),  # W dino part (bf16)
                pl.BlockSpec((1, c_pad), lambda i: (0, 0)),    # bias (f32)
            ],
            out_specs=pl.BlockSpec((tq2, c_pad), lambda i: (i, 0)),
        ),
        compiler_params=pltpu.CompilerParams(
            dimension_semantics=("parallel",),
            vmem_limit_bytes=32 * 1024 * 1024),
    )(pf, gathered, w_b, w_d, b_p)

    return logits[:nq, :num_classes]


def offset2batch(offset, n):
    """pointcept offset2batch: cumulative offsets -> per-point batch index."""
    return jnp.searchsorted(offset, jnp.arange(n), side="right").astype(jnp.int32)


def _reference_forward(point_feat, origin_coord, origin_batch,
                       dino_coord, dino_feat, dino_batch, seg_w, seg_b):
    d2 = jnp.sum((origin_coord[:, None, :] - dino_coord[None, :, :]) ** 2, -1)
    same = origin_batch[:, None] == dino_batch[None, :]
    d2 = jnp.where(same, d2, jnp.inf)
    idx = jnp.argmin(d2, axis=-1)                       # torch_cluster.knn k=1
    feat = jnp.concatenate([point_feat, dino_feat[idx]], axis=-1)
    return feat @ seg_w + seg_b


if __name__ == "__main__":
    # Small synthetic problem: 2 batches, 64 query (origin) points, 128 dino
    # points, backbone feat 32-d, dino feat 32-d, backbone_out_channels = 64,
    # num_classes = 16.
    key = jax.random.PRNGKey(0)
    k1, k2, k3, k4, k5, k6 = jax.random.split(key, 6)

    n_q, n_d = 64, 128
    c_b, c_d = 32, 32
    num_classes = 16

    origin_coord = jax.random.uniform(k1, (n_q, 3), jnp.float32)
    dino_coord = jax.random.uniform(k2, (n_d, 3), jnp.float32)
    point_feat = jax.random.normal(k3, (n_q, c_b), jnp.float32)   # backbone output
    dino_feat = jax.random.normal(k4, (n_d, c_d), jnp.float32)

    origin_offset = jnp.array([32, 64], jnp.int32)
    dino_offset = jnp.array([64, 128], jnp.int32)
    origin_batch = offset2batch(origin_offset, n_q)
    dino_batch = offset2batch(dino_offset, n_d)

    # Deterministic seg_head params (nn.Linear(backbone_out_channels, num_classes)).
    seg_w = 0.02 * jax.random.normal(k5, (c_b + c_d, num_classes), jnp.float32)
    seg_b = 0.01 * jax.random.normal(k6, (1, num_classes), jnp.float32)

    seg_logits = dino_enhanced_segmentor_forward(
        point_feat, origin_coord, origin_batch,
        dino_coord, dino_feat, dino_batch, seg_w, seg_b)
    seg_logits = jax.block_until_ready(seg_logits)

    ref = _reference_forward(point_feat, origin_coord, origin_batch,
                             dino_coord, dino_feat, dino_batch, seg_w, seg_b)
    assert seg_logits.shape == (n_q, num_classes)
    # Pass 2 runs in bf16 (f32 accumulate); tolerance loosened accordingly.
    assert jnp.allclose(seg_logits, ref, rtol=2e-2, atol=1e-2)

    print("KERNEL_OK")
</pallas_src>

<mosaic_0001>
module attributes {stable_mosaic.version = 11 : i64} {
  func.func @_knn_argmin_kernel(%arg0: i32, %arg1: i32, %arg2: memref<256x8xf32, #tpu.memory_space<vmem>>, %arg3: memref<256x1xi32, #tpu.memory_space<vmem>>, %arg4: memref<8x256xf32, #tpu.memory_space<vmem>>, %arg5: memref<1x256xi32, #tpu.memory_space<vmem>>, %arg6: memref<256x1xi32, #tpu.memory_space<vmem>>, %arg7: memref<256x1xf32, #tpu.memory_space<vmem>>, %arg8: memref<256x1xi32, #tpu.memory_space<vmem>>) attributes {dimension_semantics = [#tpu.dimension_semantics<parallel>, #tpu.dimension_semantics<arbitrary>], iteration_bounds = array<i64: 1, 1>, scalar_prefetch = 0 : i64, scratch_operands = 2 : i64, tpu.core_type = #tpu.core_type<tc>, window_params = [{transform_indices = @transform_0, window_bounds = array<i64: 256, 8>}, {transform_indices = @transform_1, window_bounds = array<i64: 256, 1>}, {transform_indices = @transform_2, window_bounds = array<i64: 8, 256>}, {transform_indices = @transform_3, window_bounds = array<i64: 1, 256>}, {transform_indices = @transform_4, window_bounds = array<i64: 256, 1>}]} {
    %c0_i32 = arith.constant 0 : i32
    %0 = arith.cmpi eq, %arg1, %c0_i32 : i32
    %1 = arith.extui %0 : i1 to i32
    %c0_i32_0 = arith.constant 0 : i32
    %2 = arith.cmpi ne, %1, %c0_i32_0 : i32
    scf.if %2 {
      %cst_24 = arith.constant 0x7F800000 : f32
      %36 = vector.broadcast %cst_24 : f32 to vector<256x1xf32>
      %c0_25 = arith.constant 0 : index
      %c0_26 = arith.constant 0 : index
      %37 = vector.load %arg7[%c0_25, %c0_26] : memref<256x1xf32, #tpu.memory_space<vmem>>, vector<256x1xf32>
      tpu.vector_store %arg7[%c0_25, %c0_26], %36 {strides = array<i32>} : memref<256x1xf32, #tpu.memory_space<vmem>>, vector<256x1xf32>,
      %c0_i32_27 = arith.constant 0 : i32
      %38 = vector.broadcast %c0_i32_27 : i32 to vector<256x1xi32>
      %c0_28 = arith.constant 0 : index
      %c0_29 = arith.constant 0 : index
      %39 = vector.load %arg8[%c0_28, %c0_29] : memref<256x1xi32, #tpu.memory_space<vmem>>, vector<256x1xi32>
      tpu.vector_store %arg8[%c0_28, %c0_29], %38 {strides = array<i32>} : memref<256x1xi32, #tpu.memory_space<vmem>>, vector<256x1xi32>,
    } else {
    }
    %c0 = arith.constant 0 : index
    %c0_1 = arith.constant 0 : index
    %3 = vector.load %arg2[%c0, %c0_1] : memref<256x8xf32, #tpu.memory_space<vmem>>, vector<256x8xf32>
    %c0_2 = arith.constant 0 : index
    %c0_3 = arith.constant 0 : index
    %4 = vector.load %arg4[%c0_2, %c0_3] : memref<8x256xf32, #tpu.memory_space<vmem>>, vector<8x256xf32>
    %cst = arith.constant dense<0.000000e+00> : vector<256x256xf32>
    %5 = tpu.matmul %3, %4, %cst {dimension_numbers = #tpu.dot_dimension_numbers<[1], [0], [0], [1], [0, 0, 1, 1], [], []>} : vector<256x8xf32>, vector<8x256xf32>, vector<256x256xf32> -> vector<256x256xf32>
    %c0_4 = arith.constant 0 : index
    %c0_5 = arith.constant 0 : index
    %6 = vector.load %arg3[%c0_4, %c0_5] : memref<256x1xi32, #tpu.memory_space<vmem>>, vector<256x1xi32>
    %c0_6 = arith.constant 0 : index
    %c0_7 = arith.constant 0 : index
    %7 = vector.load %arg5[%c0_6, %c0_7] : memref<1x256xi32, #tpu.memory_space<vmem>>, vector<1x256xi32>
    %8 = vector.broadcast %6 : vector<256x1xi32> to vector<256x256xi32>
    %9 = vector.broadcast %7 : vector<1x256xi32> to vector<256x256xi32>
    %10 = arith.cmpi eq, %8, %9 : vector<256x256xi32>
    %cst_8 = arith.constant 0x7F800000 : f32
    %11 = vector.broadcast %cst_8 : f32 to vector<256x256xf32>
    %12 = arith.select %10, %5, %11 : vector<256x256xi1>, vector<256x256xf32>
    %cst_9 = arith.constant dense<0x7F800000> : vector<256xf32>
    %13 = vector.multi_reduction <minimumf>, %12, %cst_9 [1] : vector<256x256xf32> to vector<256xf32>
    %14 = vector.shape_cast %13 : vector<256xf32> to vector<256x1xf32>
    %15 = tpu.iota {dimensions = array<i32: 1>} : vector<256x256xi32>
    %16 = vector.broadcast %14 : vector<256x1xf32> to vector<256x256xf32>
    %17 = arith.cmpf oeq, %12, %16 : vector<256x256xf32>
    %c256_i32 = arith.constant 256 : i32
    %18 = vector.broadcast %c256_i32 : i32 to vector<256x256xi32>
    %19 = arith.select %17, %15, %18 : vector<256x256xi1>, vector<256x256xi32>
    %cst_10 = arith.constant dense<2147483647> : vector<256xi32>
    %20 = vector.multi_reduction <minsi>, %19, %cst_10 [1] : vector<256x256xi32> to vector<256xi32>
    %21 = vector.shape_cast %20 : vector<256xi32> to vector<256x1xi32>
    %c256_i32_11 = arith.constant 256 : i32
    %22 = arith.muli %arg1, %c256_i32_11 : i32
    %23 = vector.broadcast %22 : i32 to vector<256x1xi32>
    %24 = arith.addi %21, %23 : vector<256x1xi32>
    %c0_12 = arith.constant 0 : index
    %c0_13 = arith.constant 0 : index
    %25 = vector.load %arg7[%c0_12, %c0_13] : memref<256x1xf32, #tpu.memory_space<vmem>>, vector<256x1xf32>
    %26 = arith.cmpf olt, %14, %25 : vector<256x1xf32>
    %c0_14 = arith.constant 0 : index
    %c0_15 = arith.constant 0 : index
    %27 = vector.load %arg8[%c0_14, %c0_15] : memref<256x1xi32, #tpu.memory_space<vmem>>, vector<256x1xi32>
    %28 = arith.select %26, %24, %27 : vector<256x1xi1>, vector<256x1xi32>
    %c0_16 = arith.constant 0 : index
    %c0_17 = arith.constant 0 : index
    %29 = vector.load %arg8[%c0_16, %c0_17] : memref<256x1xi32, #tpu.memory_space<vmem>>, vector<256x1xi32>
    tpu.vector_store %arg8[%c0_16, %c0_17], %28 {strides = array<i32>} : memref<256x1xi32, #tpu.memory_space<vmem>>, vector<256x1xi32>,
    %c0_18 = arith.constant 0 : index
    %c0_19 = arith.constant 0 : index
    %30 = vector.load %arg7[%c0_18, %c0_19] : memref<256x1xf32, #tpu.memory_space<vmem>>, vector<256x1xf32>
    %31 = arith.minimumf %30, %14 : vector<256x1xf32>
    %c0_20 = arith.constant 0 : index
    %c0_21 = arith.constant 0 : index
    %32 = vector.load %arg7[%c0_20, %c0_21] : memref<256x1xf32, #tpu.memory_space<vmem>>, vector<256x1xf32>
    tpu.vector_store %arg7[%c0_20, %c0_21], %31 {strides = array<i32>} : memref<256x1xf32, #tpu.memory_space<vmem>>, vector<256x1xf32>,
    %c0_i32_22 = arith.constant 0 : i32
    %33 = arith.cmpi eq, %arg1, %c0_i32_22 : i32
    %34 = arith.extui %33 : i1 to i32
    %c0_i32_23 = arith.constant 0 : i32
    %35 = arith.cmpi ne, %34, %c0_i32_23 : i32
    scf.if %35 {
      %c0_24 = arith.constant 0 : index
      %c0_25 = arith.constant 0 : index
      %36 = vector.load %arg8[%c0_24, %c0_25] : memref<256x1xi32, #tpu.memory_space<vmem>>, vector<256x1xi32>
      %c0_26 = arith.constant 0 : index
      %c0_27 = arith.constant 0 : index
      %37 = vector.load %arg6[%c0_26, %c0_27] : memref<256x1xi32, #tpu.memory_space<vmem>>, vector<256x1xi32>
      tpu.vector_store %arg6[%c0_26, %c0_27], %36 {strides = array<i32>} : memref<256x1xi32, #tpu.memory_space<vmem>>, vector<256x1xi32>,
    } else {
    }
    return
  }
  func.func @transform_0(%arg0: i32, %arg1: i32) -> (i32, i32) {
    %c0_i32 = arith.constant 0 : i32
    %c0_i32_0 = arith.constant 0 : i32
    return %arg0, %c0_i32 : i32, i32
  }
  func.func @transform_1(%arg0: i32, %arg1: i32) -> (i32, i32) {
    %c0_i32 = arith.constant 0 : i32
    %c0_i32_0 = arith.constant 0 : i32
    return %arg0, %c0_i32 : i32, i32
  }
  func.func @transform_2(%arg0: i32, %arg1: i32) -> (i32, i32) {
    %c0_i32 = arith.constant 0 : i32
    %c0_i32_0 = arith.constant 0 : i32
    return %c0_i32, %arg1 : i32, i32
  }
  func.func @transform_3(%arg0: i32, %arg1: i32) -> (i32, i32) {
    %c0_i32 = arith.constant 0 : i32
    %c0_i32_0 = arith.constant 0 : i32
    return %c0_i32, %arg1 : i32, i32
  }
  func.func @transform_4(%arg0: i32, %arg1: i32) -> (i32, i32) {
    %c0_i32 = arith.constant 0 : i32
    %c0_i32_0 = arith.constant 0 : i32
    return %arg0, %c0_i32 : i32, i32
  }
}

</mosaic_0001>

<bundles_post_ra>
// kernel: tpu_custom_call.1
= control target key start
LH: loop header
LB: loop body
LE: loop exit
PB: predicated region body
PF: predicated region fallthrough
CT: control target
= control target key end

     0   :  { %v3757_v0 = vmov 0   ;;  %vm120_vm0 = vcmask 64512   ;;  %s3752_s2 = inlined_call_operand.vmem [shape: f32[8,256], index: 2, kind: input, shape index: {}]   ;;  %s3753_s1 = inlined_call_operand.vmem [shape: s32[256,1], index: 1, kind: input, shape index: {}]   ;;  %s3754_s0 = inlined_call_operand.vmem [shape: f32[256,8], index: 0, kind: input, shape index: {}]   ;;  %s3755_s3 = inlined_call_operand.vmem [shape: s32[1,256], index: 3, kind: input, shape index: {}]   ;;  %s3756_s4 = inlined_call_operand.vmem [shape: s32[256,1], index: 4, kind: output, shape index: {}]  }
   0x1   :  { %1873 = vset.pattern.permute.xlu2 %v3757_v0  ;;  %1872 = vset.pattern.permute.xlu1 %v3757_v0  ;;  %v118_v1 = vld [vmem:[%s3752_s2] sm:$0xff]  ;;  %v119_v2 = vld [vmem:[%s3752_s2 + $0x8] sm:$0xff]  ;;  %v445_v4 = vld [vmem:[%s3753_s1 + $0x10] sm:$0xff] }
   0x2   :  { %v447_v3 = vld [vmem:[%s3753_s1 + $0x20] sm:$0xff]  ;;  %1871 = vset.pattern.permute.xlu0 %v3757_v0  ;;  %232 = vmatpush.msra.mxu0 %v118_v1  ;;  %v448_v8 = vld [vmem:[%s3753_s1 + $0x28] sm:$0xff]  ;;  %v446_v9 = vld [vmem:[%s3753_s1 + $0x18] sm:$0xff] }
   0x3   :  { %v443_v5 = vld [vmem:[%s3753_s1] sm:$0xff]  ;;  %1867 = vmatpush.msra.mxu2 %v118_v1  ;;  %345 = vmatpush.msra.mxu1 %v119_v2  ;;  %v444_v10 = vld [vmem:[%s3753_s1 + $0x8] sm:$0xff]  ;;  %v450_v14 = vld [vmem:[%s3753_s1 + $0x38] sm:$0xff] }
   0x4   :  { %v86_v6 = vld [vmem:[%s3754_s0] sm:$0xff]  ;;  %1868 = vmatpush.msra.mxu3 %v119_v2  ;;  %489 = vperm.xlu2 %1873, %v447_v3   ;;  %v87_v11 = vld [vmem:[%s3754_s0 + $0x8] sm:$0xff]  ;;  %v449_v15 = vld [vmem:[%s3753_s1 + $0x30] sm:$0xff] }
   0x5   :  { %v102_v7 = vld [vmem:[%s3754_s0 + $0x80] sm:$0xff]  ;;  %483 = vperm.xlu1 %1872, %v445_v4   ;;  %477 = vperm.xlu0 %1871, %v443_v5   ;;  %v103_v12 = vld [vmem:[%s3754_s0 + $0x88] sm:$0xff]  ;;  %v88_v16 = vld [vmem:[%s3754_s0 + $0x10] sm:$0xff] }
   0x6   :  { %1803 = vmatmul.msk.f32.vlgmr.msra.gmra.mxu0 %vm120_vm0, %v86_v6  ;;  %1819 = vmatmul.msk.f32.vlgmr.msra.gmra.mxu2 %vm120_vm0, %v102_v7  ;;  %v451_v13 = vld [vmem:[%s3753_s1 + $0x40] sm:$0xff]  ;;  %v104_v17 = vld [vmem:[%s3754_s0 + $0x90] sm:$0xff]  ;;  %v454_v18 = vld [vmem:[%s3753_s1 + $0x58] sm:$0xff] }
   0x7   :  { %1835 = vmatmul.msk.f32.vlgmr.msra.gmra.mxu1 %vm120_vm0, %v86_v6  ;;  %1851 = vmatmul.msk.f32.vlgmr.msra.gmra.mxu3 %vm120_vm0, %v102_v7  ;;  %v453_v19 = vld [vmem:[%s3753_s1 + $0x50] sm:$0xff]  ;;  %v452_v20 = vld [vmem:[%s3753_s1 + $0x48] sm:$0xff]  ;;  %v89_v21 = vld [vmem:[%s3754_s0 + $0x18] sm:$0xff] }
   0x8   :  { %v105_v22 = vld [vmem:[%s3754_s0 + $0x98] sm:$0xff]  ;;  %v457_v23 = vld [vmem:[%s3753_s1 + $0x70] sm:$0xff]  ;;  %v456_v24 = vld [vmem:[%s3753_s1 + $0x68] sm:$0xff] }
   0x9   :  { %v455_v25 = vld [vmem:[%s3753_s1 + $0x60] sm:$0xff]  ;;  %v460_v28 = vld [vmem:[%s3753_s1 + $0x88] sm:$0xff]  ;;  %v458_v30 = vld [vmem:[%s3753_s1 + $0x78] sm:$0xff] }
   0xa   :  { %v90_v26 = vld [vmem:[%s3754_s0 + $0x20] sm:$0xff]  ;;  %v91_v31 = vld [vmem:[%s3754_s0 + $0x28] sm:$0xff]  ;;  %v462_v34 = vld [vmem:[%s3753_s1 + $0x98] sm:$0xff] }
   0xb   :  { %v106_v27 = vld [vmem:[%s3754_s0 + $0xa0] sm:$0xff]  ;;  %v107_v32 = vld [vmem:[%s3754_s0 + $0xa8] sm:$0xff]  ;;  %v461_v35 = vld [vmem:[%s3753_s1 + $0x90] sm:$0xff] }
   0xc   :  { %492 = vperm.xlu2 %1873, %v448_v8   ;;  %v459_v29 = vld [vmem:[%s3753_s1 + $0x80] sm:$0xff]  ;;  %v92_v36 = vld [vmem:[%s3754_s0 + $0x30] sm:$0xff]  ;;  %v466_v38 = vld [vmem:[%s3753_s1 + $0xb8] sm:$0xff] }
   0xd   :  { %486 = vperm.xlu1 %1872, %v446_v9   ;;  %480 = vperm.xlu0 %1871, %v444_v10   ;;  %v463_v33 = vld [vmem:[%s3753_s1 + $0xa0] sm:$0xff]  ;;  %v108_v37 = vld [vmem:[%s3754_s0 + $0xb0] sm:$0xff]  ;;  %v464_v40 = vld [vmem:[%s3753_s1 + $0xa8] sm:$0xff] }
   0xe   :  { %1804 = vmatmul.msk.f32.gmra.mxu0 %vm120_vm0, %v87_v11  ;;  %1820 = vmatmul.msk.f32.gmra.mxu2 %vm120_vm0, %v103_v12  ;;  %v465_v39 = vld [vmem:[%s3753_s1 + $0xb0] sm:$0xff]  ;;  %v93_v41 = vld [vmem:[%s3754_s0 + $0x38] sm:$0xff]  ;;  %v468_v44 = vld [vmem:[%s3753_s1 + $0xc8] sm:$0xff] }
   0xf   :  { %1836 = vmatmul.msk.f32.gmra.mxu1 %vm120_vm0, %v87_v11  ;;  %1852 = vmatmul.msk.f32.gmra.mxu3 %vm120_vm0, %v103_v12  ;;  %v109_v42 = vld [vmem:[%s3754_s0 + $0xb8] sm:$0xff]  ;;  %v469_v43 = vld [vmem:[%s3753_s1 + $0xd0] sm:$0xff]  ;;  %v467_v45 = vld [vmem:[%s3753_s1 + $0xc0] sm:$0xff] }
  0x10   :  { %v94_v46 = vld [vmem:[%s3754_s0 + $0x40] sm:$0xff]  ;;  %v472_v48 = vld [vmem:[%s3753_s1 + $0xe8] sm:$0xff]  ;;  %v470_v50 = vld [vmem:[%s3753_s1 + $0xd8] sm:$0xff] }
  0x11   :  { %v110_v47 = vld [vmem:[%s3754_s0 + $0xc0] sm:$0xff]  ;;  %v95_v51 = vld [vmem:[%s3754_s0 + $0x48] sm:$0xff]  ;;  %v474_v53 = vld [vmem:[%s3753_s1 + $0xf8] sm:$0xff] }
  0x12   :  { %v471_v49 = vld [vmem:[%s3753_s1 + $0xe0] sm:$0xff]  ;;  %v111_v52 = vld [vmem:[%s3754_s0 + $0xc8] sm:$0xff]  ;;  %v473_v54 = vld [vmem:[%s3753_s1 + $0xf0] sm:$0xff] }
  0x13   :  { %v96_v55 = vld [vmem:[%s3754_s0 + $0x50] sm:$0xff]  ;;  %v97_v57 = vld [vmem:[%s3754_s0 + $0x58] sm:$0xff]  ;;  %v98_v60 = vld [vmem:[%s3754_s0 + $0x60] sm:$0xff] }
  0x14   :  { %501 = vperm.xlu2 %1873, %v451_v13   ;;  %v112_v56 = vld [vmem:[%s3754_s0 + $0xd0] sm:$0xff]  ;;  %v113_v58 = vld [vmem:[%s3754_s0 + $0xd8] sm:$0xff]  ;;  %v114_v61 = vld [vmem:[%s3754_s0 + $0xe0] sm:$0xff] }
  0x15   :  { %498 = vperm.xlu1 %1872, %v450_v14   ;;  %495 = vperm.xlu0 %1871, %v449_v15   ;;  %v99_v63 = vld [vmem:[%s3754_s0 + $0x68] sm:$0xff]  ;;  %v100_v3 = vld [vmem:[%s3754_s0 + $0x70] sm:$0xff]  ;;  %v101_v8 = vld [vmem:[%s3754_s0 + $0x78] sm:$0xff] }
  0x16   :  { %1805 = vmatmul.msk.f32.gmra.mxu0 %vm120_vm0, %v88_v16  ;;  %1821 = vmatmul.msk.f32.gmra.mxu2 %vm120_vm0, %v104_v17  ;;  %v115_v1 = vld [vmem:[%s3754_s0 + $0xe8] sm:$0xff]  ;;  %v116_v4 = vld [vmem:[%s3754_s0 + $0xf0] sm:$0xff]  ;;  %v117_v9 = vld [vmem:[%s3754_s0 + $0xf8] sm:$0xff] }
  0x17   :  { %1837 = vmatmul.msk.f32.gmra.mxu1 %vm120_vm0, %v88_v16  ;;  %1853 = vmatmul.msk.f32.gmra.mxu3 %vm120_vm0, %v104_v17  ;;  %v475_v10 = vld [vmem:[%s3755_s3] sm:$0x3] }
  0x18   :  { %v2179_v13 = vperm.slane %v475_v10, 0  ;;  %v2181_v14 = vperm.slane %v475_v10, 1 }
  0x1c   :  { %510 = vperm.xlu2 %1873, %v454_v18  }
  0x1d   :  { %507 = vperm.xlu1 %1872, %v453_v19   ;;  %504 = vperm.xlu0 %1871, %v452_v20  }
  0x1e   :  { %1806 = vmatmul.msk.f32.gmra.mxu0 %vm120_vm0, %v89_v21  ;;  %1822 = vmatmul.msk.f32.gmra.mxu2 %vm120_vm0, %v105_v22 }
  0x1f   :  { %1838 = vmatmul.msk.f32.gmra.mxu1 %vm120_vm0, %v89_v21  ;;  %1854 = vmatmul.msk.f32.gmra.mxu3 %vm120_vm0, %v105_v22 }
  0x24   :  { %519 = vperm.xlu2 %1873, %v457_v23  }
  0x25   :  { %516 = vperm.xlu1 %1872, %v456_v24   ;;  %513 = vperm.xlu0 %1871, %v455_v25  }
  0x26   :  { %1807 = vmatmul.msk.f32.gmra.mxu0 %vm120_vm0, %v90_v26  ;;  %1823 = vmatmul.msk.f32.gmra.mxu2 %vm120_vm0, %v106_v27 }
  0x27   :  { %1839 = vmatmul.msk.f32.gmra.mxu1 %vm120_vm0, %v90_v26  ;;  %1855 = vmatmul.msk.f32.gmra.mxu3 %vm120_vm0, %v106_v27 }
  0x2c   :  { %528 = vperm.xlu2 %1873, %v460_v28  }
  0x2d   :  { %525 = vperm.xlu1 %1872, %v459_v29   ;;  %522 = vperm.xlu0 %1871, %v458_v30  }
  0x2e   :  { %1808 = vmatmul.msk.f32.gmra.mxu0 %vm120_vm0, %v91_v31  ;;  %1824 = vmatmul.msk.f32.gmra.mxu2 %vm120_vm0, %v107_v32 }
  0x2f   :  { %1840 = vmatmul.msk.f32.gmra.mxu1 %vm120_vm0, %v91_v31  ;;  %1856 = vmatmul.msk.f32.gmra.mxu3 %vm120_vm0, %v107_v32 }
  0x34   :  { %537 = vperm.xlu2 %1873, %v463_v33  }
  0x35   :  { %534 = vperm.xlu1 %1872, %v462_v34   ;;  %531 = vperm.xlu0 %1871, %v461_v35  }
  0x36   :  { %1809 = vmatmul.msk.f32.gmra.mxu0 %vm120_vm0, %v92_v36  ;;  %1825 = vmatmul.msk.f32.gmra.mxu2 %vm120_vm0, %v108_v37 }
  0x37   :  { %1841 = vmatmul.msk.f32.gmra.mxu1 %vm120_vm0, %v92_v36  ;;  %1857 = vmatmul.msk.f32.gmra.mxu3 %vm120_vm0, %v108_v37 }
  0x3c   :  { %546 = vperm.xlu2 %1873, %v466_v38  }
  0x3d   :  { %543 = vperm.xlu1 %1872, %v465_v39   ;;  %540 = vperm.xlu0 %1871, %v464_v40  }
  0x3e   :  { %1810 = vmatmul.msk.f32.gmra.mxu0 %vm120_vm0, %v93_v41  ;;  %1826 = vmatmul.msk.f32.gmra.mxu2 %vm120_vm0, %v109_v42 }
  0x3f   :  { %1842 = vmatmul.msk.f32.gmra.mxu1 %vm120_vm0, %v93_v41  ;;  %1858 = vmatmul.msk.f32.gmra.mxu3 %vm120_vm0, %v109_v42 }
  0x44   :  { %555 = vperm.xlu2 %1873, %v469_v43  }
  0x45   :  { %552 = vperm.xlu1 %1872, %v468_v44   ;;  %549 = vperm.xlu0 %1871, %v467_v45  }
  0x46   :  { %1811 = vmatmul.msk.f32.gmra.mxu0 %vm120_vm0, %v94_v46  ;;  %1827 = vmatmul.msk.f32.gmra.mxu2 %vm120_vm0, %v110_v47 }
  0x47   :  { %1843 = vmatmul.msk.f32.gmra.mxu1 %vm120_vm0, %v94_v46  ;;  %1859 = vmatmul.msk.f32.gmra.mxu3 %vm120_vm0, %v110_v47 }
  0x4c   :  { %564 = vperm.xlu2 %1873, %v472_v48  }
  0x4d   :  { %561 = vperm.xlu1 %1872, %v471_v49   ;;  %558 = vperm.xlu0 %1871, %v470_v50  }
  0x4e   :  { %1812 = vmatmul.msk.f32.gmra.mxu0 %vm120_vm0, %v95_v51  ;;  %1828 = vmatmul.msk.f32.gmra.mxu2 %vm120_vm0, %v111_v52 }
  0x4f   :  { %1844 = vmatmul.msk.f32.gmra.mxu1 %vm120_vm0, %v95_v51  ;;  %1860 = vmatmul.msk.f32.gmra.mxu3 %vm120_vm0, %v111_v52 }
  0x55   :  { %570 = vperm.xlu1 %1872, %v474_v53   ;;  %567 = vperm.xlu0 %1871, %v473_v54  }
  0x56   :  { %1813 = vmatmul.msk.f32.gmra.mxu0 %vm120_vm0, %v96_v55  ;;  %1829 = vmatmul.msk.f32.gmra.mxu2 %vm120_vm0, %v112_v56 }
  0x57   :  { %1845 = vmatmul.msk.f32.gmra.mxu1 %vm120_vm0, %v96_v55  ;;  %1861 = vmatmul.msk.f32.gmra.mxu3 %vm120_vm0, %v112_v56 }
  0x5e   :  { %1814 = vmatmul.msk.f32.gmra.mxu0 %vm120_vm0, %v97_v57  ;;  %1830 = vmatmul.msk.f32.gmra.mxu2 %vm120_vm0, %v113_v58  ;;  %v2124_v59 = vpop.permute.xlu2 %489 }
  0x5f   :  { %1846 = vmatmul.msk.f32.gmra.mxu1 %vm120_vm0, %v97_v57  ;;  %1862 = vmatmul.msk.f32.gmra.mxu3 %vm120_vm0, %v113_v58 }
  0x66   :  { %1815 = vmatmul.msk.f32.gmra.mxu0 %vm120_vm0, %v98_v60  ;;  %1831 = vmatmul.msk.f32.gmra.mxu2 %vm120_vm0, %v114_v61  ;;  %v2136_v62 = vpop.permute.xlu2 %492 }
  0x67   :  { %1847 = vmatmul.msk.f32.gmra.mxu1 %vm120_vm0, %v98_v60  ;;  %1863 = vmatmul.msk.f32.gmra.mxu3 %vm120_vm0, %v114_v61 }
  0x6e   :  { %1816 = vmatmul.msk.f32.gmra.mxu0 %vm120_vm0, %v99_v63  ;;  %1832 = vmatmul.msk.f32.gmra.mxu2 %vm120_vm0, %v115_v1  ;;  %v2150_v2 = vpop.permute.xlu2 %501 }
  0x6f   :  { %1848 = vmatmul.msk.f32.gmra.mxu1 %vm120_vm0, %v99_v63  ;;  %1864 = vmatmul.msk.f32.gmra.mxu3 %vm120_vm0, %v115_v1 }
  0x76   :  { %1817 = vmatmul.msk.f32.gmra.mxu0 %vm120_vm0, %v100_v3  ;;  %1833 = vmatmul.msk.f32.gmra.mxu2 %vm120_vm0, %v116_v4  ;;  %v2162_v7 = vpop.permute.xlu2 %510 }
  0x77   :  { %1849 = vmatmul.msk.f32.gmra.mxu1 %vm120_vm0, %v100_v3  ;;  %1865 = vmatmul.msk.f32.gmra.mxu3 %vm120_vm0, %v116_v4  ;;  %v484_v5 = vpop.permute.xlu1 %483  ;;  %v478_v6 = vpop.permute.xlu0 %477 }
  0x78   :  { %vm574_vm1 = vcmp.eq.s32.totalorder %v478_v6, %v2179_v13  ;;  %vm575_vm2 = vcmp.eq.s32.totalorder %v478_v6, %v2181_v14  ;;  %vm578_vm7 = vcmp.eq.s32.totalorder %v484_v5, %v2179_v13  ;;  %vm579_vm8 = vcmp.eq.s32.totalorder %v484_v5, %v2181_v14 }
  0x7e   :  { %1818 = vmatmul.msk.f32.gmra.mxu0 %vm120_vm0, %v101_v8  ;;  %1834 = vmatmul.msk.f32.gmra.mxu2 %vm120_vm0, %v117_v9  ;;  %v2185_v16 = vpop.permute.xlu2 %519 }
  0x7f   :  { %1850 = vmatmul.msk.f32.gmra.mxu1 %vm120_vm0, %v101_v8  ;;  %1866 = vmatmul.msk.f32.gmra.mxu3 %vm120_vm0, %v117_v9  ;;  %v2177_v11 = vpop.permute.xlu1 %486  ;;  %v481_v12 = vpop.permute.xlu0 %480 }
  0x80   :  { %vm576_vm3 = vcmp.eq.s32.totalorder %v481_v12, %v2179_v13  ;;  %vm577_vm4 = vcmp.eq.s32.totalorder %v481_v12, %v2181_v14  ;;  %vm580_vm11 = vcmp.eq.s32.totalorder %v2177_v11, %v2179_v13  ;;  %vm581_vm12 = vcmp.eq.s32.totalorder %v2177_v11, %v2181_v14 }
  0x83   :  { %v234_v15 = vpop.f32.mrf.mxu0 }
  0x84   :  { %v2187_v17 = vsel %vm574_vm1, %v234_v15, inf  ;;  %v347_v18 = vpop.f32.mrf.mxu1 }
  0x85   :  { %v2189_v19 = vsel %vm575_vm2, %v347_v18, inf }
  0x86   :  { %v702_v20 = vmin.f32 %v2187_v17, %v2189_v19  ;;  %v529_v29 = vpop.permute.xlu2 %528 }
  0x87   :  { %v2193_v21 = vpop.permute.xlu1 %498  ;;  %v2195_v22 = vpop.permute.xlu0 %495  ;;  %vm608_vm5 = vcmp.eq.s32.totalorder %v529_v29, %v2179_v13  ;;  %vm609_vm6 = vcmp.eq.s32.totalorder %v529_v29, %v2181_v14 }
  0x88   :  { %703 = vmin.xlane.f32.xlu2 %v702_v20 }
  0x89   :  { %v282_v23 = vpop.f32.mrf.mxu2 }
  0x8a   :  { %v395_v24 = vpop.f32.mrf.mxu3 }
  0x8b   :  { %v237_v25 = vpop.f32.mrf.mxu0 }
  0x8c   :  { %v2199_v26 = vsel %vm576_vm3, %v237_v25, inf  ;;  %v350_v27 = vpop.f32.mrf.mxu1  ;;  %vm584_vm3 = vcmp.eq.s32.totalorder %v2136_v62, %v2179_v13 }
  0x8d   :  { %v2201_v28 = vsel %vm577_vm4, %v350_v27, inf  ;;  %vm585_vm4 = vcmp.eq.s32.totalorder %v2136_v62, %v2181_v14 }
  0x8e   :  { %v705_v30 = vmin.f32 %v2199_v26, %v2201_v28  ;;  %v538_v58 = vpop.permute.xlu2 %537 }
  0x8f   :  { %v2205_v31 = vpop.permute.xlu1 %507  ;;  %v2207_v32 = vpop.permute.xlu0 %504  ;;  %vm614_vm15 = vcmp.eq.s32.totalorder %v538_v58, %v2179_v13  ;;  %vm615_vm0 = vcmp.eq.s32.totalorder %v538_v58, %v2181_v14 }
  0x90   :  { %706 = vmin.xlane.f32.xlu0 %v705_v30 }
  0x91   :  { %v285_v33 = vpop.f32.mrf.mxu2 }
  0x92   :  { %v398_v34 = vpop.f32.mrf.mxu3  ;;  %v2211_v35 = vsel %vm608_vm5, %v285_v33, inf }
  0x93   :  { %v2213_v36 = vsel %vm609_vm6, %v398_v34, inf  ;;  %v240_v37 = vpop.f32.mrf.mxu0 }
  0x94   :  { %v2216_v38 = vsel %vm578_vm7, %v240_v37, inf  ;;  %v353_v39 = vpop.f32.mrf.mxu1  ;;  %v753_v41 = vmin.f32 %v2211_v35, %v2213_v36  ;;  %vm582_vm7 = vcmp.eq.s32.totalorder %v2124_v59, %v2179_v13 }
  0x95   :  { %v2219_v40 = vsel %vm579_vm8, %v353_v39, inf  ;;  %vm583_vm8 = vcmp.eq.s32.totalorder %v2124_v59, %v2181_v14 }
  0x96   :  { %v708_v42 = vmin.f32 %v2216_v38, %v2219_v40  ;;  %v547_v58 = vpop.permute.xlu2 %546 }
  0x97   :  { %v2225_v43 = vpop.permute.xlu1 %516  ;;  %v2227_v44 = vpop.permute.xlu0 %513 }
  0x98   :  { %754 = vmin.xlane.f32.xlu0 %v753_v41  ;;  %709 = vmin.xlane.f32.xlu1 %v708_v42 }
  0x99   :  { %v288_v45 = vpop.f32.mrf.mxu2 }
  0x9a   :  { %v401_v46 = vpop.f32.mrf.mxu3 }
  0x9b   :  { %v243_v47 = vpop.f32.mrf.mxu0 }
  0x9c   :  { %v356_v48 = vpop.f32.mrf.mxu1  ;;  %v2243_v60 = vsel %vm580_vm11, %v243_v47, inf }
  0x9d   :  { %v2245_v61 = vsel %vm581_vm12, %v356_v48, inf }
  0x9e   :  { %v711_v10 = vmin.f32 %v2243_v60, %v2245_v61 }
  0x9f   :  { %v526_v49 = vpop.permute.xlu1 %525  ;;  %v2229_v50 = vpop.permute.xlu0 %522 }
  0xa0   :  { %vm606_vm9 = vcmp.eq.s32.totalorder %v526_v49, %v2179_v13  ;;  %vm607_vm10 = vcmp.eq.s32.totalorder %v526_v49, %v2181_v14 }
  0xa1   :  { %v291_v51 = vpop.f32.mrf.mxu2  ;;  %v2233_v52 = vsel %vm606_vm9, %v282_v23, inf  ;;  %v2235_v53 = vsel %vm607_vm10, %v395_v24, inf  ;;  %vm586_vm9 = vcmp.eq.s32.totalorder %v2195_v22, %v2179_v13  ;;  %vm587_vm10 = vcmp.eq.s32.totalorder %v2195_v22, %v2181_v14 }
  0xa2   :  { %v404_v54 = vpop.f32.mrf.mxu3  ;;  %v750_v55 = vmin.f32 %v2233_v52, %v2235_v53 }
  0xa3   :  { %v246_v56 = vpop.f32.mrf.mxu0 }
  0xa4   :  { %v359_v57 = vpop.f32.mrf.mxu1  ;;  %751 = vmin.xlane.f32.xlu2 %v750_v55 }
  0xa7   :  { %v532_v63 = vpop.permute.xlu0 %531  ;;  %v535_v1 = vpop.permute.xlu1 %534 }
  0xa8   :  { %vm610_vm13 = vcmp.eq.s32.totalorder %v532_v63, %v2179_v13  ;;  %vm611_vm14 = vcmp.eq.s32.totalorder %v532_v63, %v2181_v14  ;;  %vm612_vm1 = vcmp.eq.s32.totalorder %v535_v1, %v2179_v13  ;;  %vm613_vm2 = vcmp.eq.s32.totalorder %v535_v1, %v2181_v14 }
  0xa9   :  { %v294_v3 = vpop.f32.mrf.mxu2  ;;  %v2250_v4 = vsel %vm610_vm13, %v288_v45, inf  ;;  %v2252_v5 = vsel %vm611_vm14, %v401_v46, inf  ;;  %v2267_v23 = vsel %vm612_vm1, %v291_v51, inf  ;;  %v2269_v24 = vsel %vm613_vm2, %v404_v54, inf }
  0xaa   :  { %v2254_v6 = vsel %vm614_vm15, %v294_v3, inf  ;;  %v407_v8 = vpop.f32.mrf.mxu3  ;;  %v756_v9 = vmin.f32 %v2250_v4, %v2252_v5  ;;  %v759_v34 = vmin.f32 %v2267_v23, %v2269_v24  ;;  %v2295_v45 = vsel %vm582_vm7, %v246_v56, inf }
  0xab   :  { %v2261_v11 = vsel %vm615_vm0, %v407_v8, inf  ;;  %v249_v12 = vpop.f32.mrf.mxu0  ;;  %v2297_v46 = vsel %vm583_vm8, %v359_v57, inf  ;;  %vm620_vm13 = vcmp.eq.s32.totalorder %v547_v58, %v2179_v13  ;;  %vm621_vm14 = vcmp.eq.s32.totalorder %v547_v58, %v2181_v14 }
  0xac   :  { %v362_v15 = vpop.f32.mrf.mxu1  ;;  %757 = vmin.xlane.f32.xlu1 %v756_v9  ;;  %712 = vmin.xlane.f32.xlu2 %v711_v10  ;;  %v762_v18 = vmin.f32 %v2254_v6, %v2261_v11  ;;  %v2277_v25 = vsel %vm584_vm3, %v249_v12, inf  ;;  %v714_v59 = vmin.f32 %v2295_v45, %v2297_v46  ;;  %vm588_vm15 = vcmp.eq.s32.totalorder %v2193_v21, %v2179_v13 }
  0xad   :  { %v2279_v27 = vsel %vm585_vm4, %v362_v15, inf  ;;  %vm589_vm0 = vcmp.eq.s32.totalorder %v2193_v21, %v2181_v14  ;;  %vm590_vm1 = vcmp.eq.s32.totalorder %v2150_v2, %v2179_v13  ;;  %vm591_vm2 = vcmp.eq.s32.totalorder %v2150_v2, %v2181_v14 }
  0xae   :  { %763 = vmin.xlane.f32.xlu0 %v762_v18  ;;  %v717_v42 = vmin.f32 %v2277_v25, %v2279_v27 }
  0xaf   :  { %v541_v20 = vpop.permute.xlu0 %540  ;;  %v544_v54 = vpop.permute.xlu1 %543 }
  0xb0   :  { %vm616_vm5 = vcmp.eq.s32.totalorder %v541_v20, %v2179_v13  ;;  %vm617_vm6 = vcmp.eq.s32.totalorder %v541_v20, %v2181_v14  ;;  %vm618_vm11 = vcmp.eq.s32.totalorder %v544_v54, %v2179_v13  ;;  %vm619_vm12 = vcmp.eq.s32.totalorder %v544_v54, %v2181_v14 }
  0xb1   :  { %v297_v29 = vpop.f32.mrf.mxu2 }
  0xb2   :  { %v2281_v30 = vsel %vm616_vm5, %v297_v29, inf  ;;  %v410_v33 = vpop.f32.mrf.mxu3  ;;  %vm592_vm5 = vcmp.eq.s32.totalorder %v2207_v32, %v2179_v13 }
  0xb3   :  { %v2285_v37 = vsel %vm617_vm6, %v410_v33, inf  ;;  %v252_v39 = vpop.f32.mrf.mxu0  ;;  %vm593_vm6 = vcmp.eq.s32.totalorder %v2207_v32, %v2181_v14 }
  0xb4   :  { %v365_v41 = vpop.f32.mrf.mxu1  ;;  %760 = vmin.xlane.f32.xlu2 %v759_v34  ;;  %v765_v62 = vmin.f32 %v2281_v30, %v2285_v37  ;;  %v2303_v47 = vsel %vm586_vm9, %v252_v39, inf  ;;  %vm594_vm9 = vcmp.eq.s32.totalorder %v2205_v31, %v2179_v13 }
  0xb5   :  { %v2305_v48 = vsel %vm587_vm10, %v365_v41, inf  ;;  %vm595_vm10 = vcmp.eq.s32.totalorder %v2205_v31, %v2181_v14 }
  0xb6   :  { %766 = vmin.xlane.f32.xlu1 %v765_v62  ;;  %718 = vmin.xlane.f32.xlu0 %v717_v42  ;;  %v720_v57 = vmin.f32 %v2303_v47, %v2305_v48 }
  0xb7   :  { %v550_v20 = vpop.permute.xlu0 %549 }
  0xb8   :  { %vm622_vm3 = vcmp.eq.s32.totalorder %v550_v20, %v2179_v13  ;;  %vm623_vm4 = vcmp.eq.s32.totalorder %v550_v20, %v2181_v14  ;;  %v556_v20 = vpop.permute.xlu2 %555 }
  0xb9   :  { %v300_v49 = vpop.f32.mrf.mxu2 }
  0xba   :  { %v413_v51 = vpop.f32.mrf.mxu3  ;;  %v2313_v22 = vsel %vm618_vm11, %v300_v49, inf  ;;  %vm626_vm11 = vcmp.eq.s32.totalorder %v556_v20, %v2179_v13 }
  0xbb   :  { %v255_v55 = vpop.f32.mrf.mxu0  ;;  %v2315_v63 = vsel %vm619_vm12, %v413_v51, inf  ;;  %vm21_vm12 = vcmask 7168  }
  0xbc   :  { %v368_v56 = vpop.f32.mrf.mxu1  ;;  %715 = vmin.xlane.f32.xlu2 %v714_v59  ;;  %v768_v9 = vmin.f32 %v2313_v22, %v2315_v63  ;;  %v2331_v29 = vsel %vm588_vm15, %v255_v55, inf  ;;  %v553_v55 = vpop.permute.xlu1 %552  ;;  %vm597_vm15 = vcmp.eq.s32.totalorder %v2162_v7, %v2181_v14 }
  0xbd   :  { %v2333_v33 = vsel %vm589_vm0, %v368_v56, inf  ;;  %vm624_vm7 = vcmp.eq.s32.totalorder %v553_v55, %v2179_v13  ;;  %vm625_vm8 = vcmp.eq.s32.totalorder %v553_v55, %v2181_v14 }
  0xbe   :  { %721 = vmin.xlane.f32.xlu1 %v720_v57  ;;  %v723_v42 = vmin.f32 %v2331_v29, %v2333_v33 }
  0xc1   :  { %v303_v1 = vpop.f32.mrf.mxu2 }
  0xc2   :  { %v2318_v3 = vsel %vm620_vm13, %v303_v1, inf  ;;  %v416_v8 = vpop.f32.mrf.mxu3  ;;  %vm627_vm13 = vcmp.eq.s32.totalorder %v556_v20, %v2181_v14 }
  0xc3   :  { %v2323_v10 = vsel %vm621_vm14, %v416_v8, inf  ;;  %v258_v12 = vpop.f32.mrf.mxu0  ;;  %vm596_vm14 = vcmp.eq.s32.totalorder %v2162_v7, %v2179_v13 }
  0xc4   :  { %v371_v15 = vpop.f32.mrf.mxu1  ;;  %769 = vmin.xlane.f32.xlu2 %v768_v9  ;;  %v771_v18 = vmin.f32 %v2318_v3, %v2323_v10  ;;  %v2339_v34 = vsel %vm590_vm1, %v258_v12, inf }
  0xc5   :  { %v2341_v39 = vsel %vm591_vm2, %v371_v15, inf  ;;  %vm598_vm2 = vcmp.eq.s32.totalorder %v2227_v44, %v2179_v13 }
  0xc6   :  { %772 = vmin.xlane.f32.xlu0 %v771_v18  ;;  %v726_v54 = vmin.f32 %v2339_v34, %v2341_v39 }
  0xc9   :  { %v306_v41 = vpop.f32.mrf.mxu2 }
  0xca   :  { %v2344_v62 = vsel %vm622_vm3, %v306_v41, inf  ;;  %v419_v21 = vpop.f32.mrf.mxu3  ;;  %vm599_vm3 = vcmp.eq.s32.totalorder %v2227_v44, %v2181_v14 }
  0xcb   :  { %v2349_v49 = vsel %vm623_vm4, %v419_v21, inf  ;;  %v261_v51 = vpop.f32.mrf.mxu0 }
  0xcc   :  { %v374_v59 = vpop.f32.mrf.mxu1  ;;  %724 = vmin.xlane.f32.xlu2 %v723_v42  ;;  %v774_v2 = vmin.f32 %v2344_v62, %v2349_v49  ;;  %v2359_v56 = vsel %vm592_vm5, %v261_v51, inf }
  0xcd   :  { %v2361_v57 = vsel %vm593_vm6, %v374_v59, inf  ;;  %vm600_vm6 = vcmp.eq.s32.totalorder %v2225_v43, %v2179_v13 }
  0xce   :  { %775 = vmin.xlane.f32.xlu1 %v774_v2  ;;  %727 = vmin.xlane.f32.xlu0 %v726_v54  ;;  %v729_v32 = vmin.f32 %v2359_v56, %v2361_v57  ;;  %v1875_v2 = vmov inf  }
  0xcf   :  { %22 = vst.msk [vmem:[#allocation2] sm:$0xff] %vm21_vm12, %v1875_v2 }
  0xd0   :  { %23 = vst.msk [vmem:[#allocation2 + $0x8] sm:$0xff] %vm21_vm12, %v1875_v2 }
  0xd1   :  { %v309_v58 = vpop.f32.mrf.mxu2  ;;  %24 = vst.msk [vmem:[#allocation2 + $0x10] sm:$0xff] %vm21_vm12, %v1875_v2 }
  0xd2   :  { %v2364_v1 = vsel %vm624_vm7, %v309_v58, inf  ;;  %v422_v8 = vpop.f32.mrf.mxu3  ;;  %25 = vst.msk [vmem:[#allocation2 + $0x18] sm:$0xff] %vm21_vm12, %v1875_v2  ;;  %vm601_vm7 = vcmp.eq.s32.totalorder %v2225_v43, %v2181_v14  ;;  %v798_v43 = vlaneseq }
  0xd3   :  { %v2367_v9 = vsel %vm625_vm8, %v422_v8, inf  ;;  %v264_v12 = vpop.f32.mrf.mxu0  ;;  %26 = vst.msk [vmem:[#allocation2 + $0x20] sm:$0xff] %vm21_vm12, %v1875_v2 }
  0xd4   :  { %v377_v15 = vpop.f32.mrf.mxu1  ;;  %v777_v18 = vmin.f32 %v2364_v1, %v2367_v9  ;;  %v2378_v41 = vsel %vm594_vm9, %v264_v12, inf  ;;  %v559_v12 = vpop.permute.xlu0 %558  ;;  %27 = vst.msk [vmem:[#allocation2 + $0x28] sm:$0xff] %vm21_vm12, %v1875_v2 }
  0xd5   :  { %v2380_v21 = vsel %vm595_vm10, %v377_v15, inf  ;;  %28 = vst.msk [vmem:[#allocation2 + $0x30] sm:$0xff] %vm21_vm12, %v1875_v2  ;;  %vm628_vm0 = vcmp.eq.s32.totalorder %v559_v12, %v2179_v13  ;;  %vm629_vm1 = vcmp.eq.s32.totalorder %v559_v12, %v2181_v14  ;;  %vm602_vm10 = vcmp.eq.s32.totalorder %v2185_v16, %v2179_v13 }
  0xd6   :  { %778 = vmin.xlane.f32.xlu2 %v777_v18  ;;  %730 = vmin.xlane.f32.xlu1 %v729_v32  ;;  %v732_v8 = vmin.f32 %v2378_v41, %v2380_v21  ;;  %29 = vst.msk [vmem:[#allocation2 + $0x38] sm:$0xff] %vm21_vm12, %v1875_v2 }
  0xd7   :  { %30 = vst.msk [vmem:[#allocation2 + $0x40] sm:$0xff] %vm21_vm12, %v1875_v2 }
  0xd8   :  { %31 = vst.msk [vmem:[#allocation2 + $0x48] sm:$0xff] %vm21_vm12, %v1875_v2 }
  0xd9   :  { %v312_v42 = vpop.f32.mrf.mxu2  ;;  %32 = vst.msk [vmem:[#allocation2 + $0x50] sm:$0xff] %vm21_vm12, %v1875_v2 }
  0xda   :  { %v2382_v51 = vsel %vm626_vm11, %v312_v42, inf  ;;  %v425_v59 = vpop.f32.mrf.mxu3  ;;  %33 = vst.msk [vmem:[#allocation2 + $0x58] sm:$0xff] %vm21_vm12, %v1875_v2  ;;  %vm603_vm11 = vcmp.eq.s32.totalorder %v2185_v16, %v2181_v14 }
  0xdb   :  { %v2387_v54 = vsel %vm627_vm13, %v425_v59, inf  ;;  %v267_v31 = vpop.f32.mrf.mxu0  ;;  %34 = vst.msk [vmem:[#allocation2 + $0x60] sm:$0xff] %vm21_vm12, %v1875_v2 }
  0xdc   :  { %v380_v55 = vpop.f32.mrf.mxu1  ;;  %v780_v58 = vmin.f32 %v2382_v51, %v2387_v54  ;;  %v2409_v15 = vsel %vm596_vm14, %v267_v31, inf  ;;  %35 = vst.msk [vmem:[#allocation2 + $0x68] sm:$0xff] %vm21_vm12, %v1875_v2 }
  0xdd   :  { %v2411_v18 = vsel %vm597_vm15, %v380_v55, inf  ;;  %36 = vst.msk [vmem:[#allocation2 + $0x70] sm:$0xff] %vm21_vm12, %v1875_v2 }
  0xde   :  { %781 = vmin.xlane.f32.xlu0 %v780_v58  ;;  %733 = vmin.xlane.f32.xlu2 %v732_v8  ;;  %v735_v58 = vmin.f32 %v2409_v15, %v2411_v18  ;;  %v562_v8 = vpop.permute.xlu1 %561  ;;  %37 = vst.msk [vmem:[#allocation2 + $0x78] sm:$0xff] %vm21_vm12, %v1875_v2 }
  0xdf   :  { %vm630_vm4 = vcmp.eq.s32.totalorder %v562_v8, %v2179_v13  ;;  %vm631_vm5 = vcmp.eq.s32.totalorder %v562_v8, %v2181_v14  ;;  %38 = vst.msk [vmem:[#allocation2 + $0x80] sm:$0xff] %vm21_vm12, %v1875_v2  ;;  %v565_v8 = vpop.permute.xlu2 %564 }
  0xe0   :  { %39 = vst.msk [vmem:[#allocation2 + $0x88] sm:$0xff] %vm21_vm12, %v1875_v2  ;;  %vm632_vm8 = vcmp.eq.s32.totalorder %v565_v8, %v2179_v13  ;;  %vm633_vm9 = vcmp.eq.s32.totalorder %v565_v8, %v2181_v14 }
  0xe1   :  { %v315_v32 = vpop.f32.mrf.mxu2  ;;  %40 = vst.msk [vmem:[#allocation2 + $0x90] sm:$0xff] %vm21_vm12, %v1875_v2 }
  0xe2   :  { %v2416_v20 = vsel %vm628_vm0, %v315_v32, inf  ;;  %v428_v42 = vpop.f32.mrf.mxu3  ;;  %41 = vst.msk [vmem:[#allocation2 + $0x98] sm:$0xff] %vm21_vm12, %v1875_v2 }
  0xe3   :  { %v2421_v7 = vsel %vm629_vm1, %v428_v42, inf  ;;  %v270_v59 = vpop.f32.mrf.mxu0  ;;  %42 = vst.msk [vmem:[#allocation2 + $0xa0] sm:$0xff] %vm21_vm12, %v1875_v2 }
  0xe4   :  { %v383_v31 = vpop.f32.mrf.mxu1  ;;  %v783_v55 = vmin.f32 %v2416_v20, %v2421_v7  ;;  %v2443_v12 = vsel %vm598_vm2, %v270_v59, inf  ;;  %43 = vst.msk [vmem:[#allocation2 + $0xa8] sm:$0xff] %vm21_vm12, %v1875_v2 }
  0xe5   :  { %3847 = vst [vmem:[#allocation4_spill] sm:$0xff] %v2443_v12  ;;  %v2445_v32 = vsel %vm599_vm3, %v383_v31, inf  ;;  %vm604_vm3 = vcmp.eq.s32.totalorder %v2229_v50, %v2179_v13 }
  0xe6   :  { %784 = vmin.xlane.f32.xlu1 %v783_v55  ;;  %736 = vmin.xlane.f32.xlu0 %v735_v58  ;;  %3848 = vst [vmem:[#allocation5_spill] sm:$0xff] %v2445_v32 }
  0xe7   :  { %44 = vst.msk [vmem:[#allocation2 + $0xb0] sm:$0xff] %vm21_vm12, %v1875_v2 }
  0xe8   :  { %45 = vst.msk [vmem:[#allocation2 + $0xb8] sm:$0xff] %vm21_vm12, %v1875_v2 }
  0xe9   :  { %v318_v42 = vpop.f32.mrf.mxu2  ;;  %46 = vst.msk [vmem:[#allocation2 + $0xc0] sm:$0xff] %vm21_vm12, %v1875_v2 }
  0xea   :  { %v2450_v55 = vsel %vm630_vm4, %v318_v42, inf  ;;  %v431_v58 = vpop.f32.mrf.mxu3  ;;  %v738_v42 = vmin.f32 %v2443_v12, %v2445_v32  ;;  %47 = vst.msk [vmem:[#allocation2 + $0xc8] sm:$0xff] %vm21_vm12, %v1875_v2  ;;  %vm605_vm4 = vcmp.eq.s32.totalorder %v2229_v50, %v2181_v14 }
  0xeb   :  { %3849 = vst [vmem:[#allocation6_spill] sm:$0xff] %v2450_v55  ;;  %v2455_v44 = vsel %vm631_vm5, %v431_v58, inf  ;;  %v273_v59 = vpop.f32.mrf.mxu0 }
  0xec   :  { %3850 = vst [vmem:[#allocation7_spill] sm:$0xff] %v2455_v44  ;;  %v386_v31 = vpop.f32.mrf.mxu1  ;;  %v786_v0 = vmin.f32 %v2450_v55, %v2455_v44  ;;  %v2477_v58 = vsel %vm600_vm6, %v273_v59, inf  ;;  %v568_v55 = vpop.permute.xlu0 %567 }
  0xed   :  { %3851 = vst [vmem:[#allocation8_spill] sm:$0xff] %v2477_v58  ;;  %v2479_v32 = vsel %vm601_vm7, %v386_v31, inf  ;;  %vm634_vm13 = vcmp.eq.s32.totalorder %v568_v55, %v2179_v13  ;;  %vm635_vm14 = vcmp.eq.s32.totalorder %v568_v55, %v2181_v14 }
  0xee   :  { %787 = vmin.xlane.f32.xlu2 %v786_v0  ;;  %739 = vmin.xlane.f32.xlu1 %v738_v42  ;;  %3852 = vst [vmem:[#allocation9_spill] sm:$0xff] %v2479_v32  ;;  %v741_v31 = vmin.f32 %v2477_v58, %v2479_v32 }
  0xef   :  { %48 = vst.msk [vmem:[#allocation2 + $0xd0] sm:$0xff] %vm21_vm12, %v1875_v2 }
  0xf0   :  { %49 = vst.msk [vmem:[#allocation2 + $0xd8] sm:$0xff] %vm21_vm12, %v1875_v2 }
  0xf1   :  { %v321_v0 = vpop.f32.mrf.mxu2  ;;  %50 = vst.msk [vmem:[#allocation2 + $0xe0] sm:$0xff] %vm21_vm12, %v1875_v2 }
  0xf2   :  { %v2484_v42 = vsel %vm632_vm8, %v321_v0, inf  ;;  %v434_v12 = vpop.f32.mrf.mxu3  ;;  %51 = vst.msk [vmem:[#allocation2 + $0xe8] sm:$0xff] %vm21_vm12, %v1875_v2 }
  0xf3   :  { %3853 = vst [vmem:[#allocation10_spill] sm:$0xff] %v2484_v42  ;;  %v2489_v44 = vsel %vm633_vm9, %v434_v12, inf  ;;  %v276_v0 = vpop.f32.mrf.mxu0  ;;  %v2503_v12 = vand.u32 127, %v798_v43  ;;  %v2518_v43 = vld [vmem:[#allocation2] sm:$0xff] }
  0xf4   :  { %3854 = vst [vmem:[#allocation11_spill] sm:$0xff] %v2489_v44  ;;  %v789_v59 = vmin.f32 %v2484_v42, %v2489_v44  ;;  %v389_v8 = vpop.f32.mrf.mxu1  ;;  %v2511_v32 = vsel %vm602_vm10, %v276_v0, inf  ;;  %v3858_v0 = vmov 0  }
  0xf5   :  { %v2513_v58 = vsel %vm603_vm11, %v389_v8, inf  ;;  %52 = vst.msk [vmem:[#allocation2 + $0xf0] sm:$0xff] %vm21_vm12, %v1875_v2  ;;  %v2528_v8 = vadd.s32 128, %v2503_v12 }
  0xf6   :  { %790 = vmin.xlane.f32.xlu0 %v789_v59  ;;  %742 = vmin.xlane.f32.xlu2 %v741_v31  ;;  %3855 = vst [vmem:[#allocation12_spill] sm:$0xff] %v2513_v58 }
  0xf7   :  { %3856 = vst [vmem:[#allocation13_spill] sm:$0xff] %v2518_v43 }
  0xf8   :  { %53 = vst.msk [vmem:[#allocation2 + $0xf8] sm:$0xff] %vm21_vm12, %v1875_v2  ;;  %v744_v2 = vmin.f32 %v2511_v32, %v2513_v58 }
  0xf9   :  { %v324_v59 = vpop.f32.mrf.mxu2  ;;  %54 = vst.msk [vmem:[#allocation3] sm:$0xff] %vm21_vm12, %v3858_v0 }
  0xfa   :  { %v2522_v31 = vsel %vm634_vm13, %v324_v59, inf  ;;  %v437_v16 = vpop.f32.mrf.mxu3  ;;  %55 = vst.msk [vmem:[#allocation3 + $0x8] sm:$0xff] %vm21_vm12, %v3858_v0 }
  0xfb   :  { %3857 = vst [vmem:[#allocation14_spill] sm:$0xff] %v2522_v31  ;;  %v2530_v44 = vsel %vm635_vm14, %v437_v16, inf  ;;  %v2532_v42 = vpop.xlane.xlu2 %703  ;;  %v571_v16 = vpop.permute.xlu1 %570 }
  0xfc   :  { %3859 = vst [vmem:[#allocation15_spill] sm:$0xff] %v2530_v44  ;;  %vm801_vm15 = vcmp.eq.f32.partialorder %v2187_v17, %v2532_v42  ;;  %vm802_vm0 = vcmp.eq.f32.partialorder %v2189_v19, %v2532_v42  ;;  %vm1507_vm1 = vcmp.lt.f32.partialorder %v2532_v42, %v2518_v43  ;;  %v1668_v55 = vmin.f32 %v2518_v43, %v2532_v42  ;;  %v279_v43 = vpop.f32.mrf.mxu0 }
  0xfd   :  { %3860 = vst [vmem:[#allocation16_spill] sm:$0xff] %v2532_v42  ;;  %v792_v59 = vmin.f32 %v2522_v31, %v2530_v44  ;;  %v865_v17 = vsel %vm801_vm15, %v2503_v12, 256  ;;  %v866_v19 = vsel %vm802_vm0, %v2528_v8, 256  ;;  %v392_v42 = vpop.f32.mrf.mxu1  ;;  %vm636_vm5 = vcmp.eq.s32.totalorder %v571_v16, %v2179_v13 }
  0xfe   :  { %56 = vst.msk [vmem:[#allocation3 + $0x10] sm:$0xff] %vm21_vm12, %v3858_v0  ;;  %745 = vmin.xlane.f32.xlu0 %v744_v2  ;;  %vm929_vm2 = vcmp.lt.s32.totalorder %v865_v17, %v866_v19  ;;  %vm637_vm6 = vcmp.eq.s32.totalorder %v571_v16, %v2181_v14  ;;  %v2611_v16 = vld [vmem:[#allocation2 + $0x10] sm:$0xff] }
  0xff   :  { %57 = vst.msk [vmem:[#allocation3 + $0x18] sm:$0xff] %vm21_vm12, %v3858_v0  ;;  %793 = vmin.xlane.f32.xlu1 %v792_v59  ;;  %v2559_v58 = vsel %vm929_vm2, %v865_v17, %v866_v19  ;;  %v2573_v17 = vsel %vm604_vm3, %v279_v43, inf  ;;  %v2575_v19 = vsel %vm605_vm4, %v392_v42, inf }
 0x100   :  { %1700 = vst.msk [vmem:[#allocation2] sm:$0xff] %vm21_vm12, %v1668_v55  ;;  %v2568_v55 = vld [vmem:[#allocation2 + $0x8] sm:$0xff]  ;;  %v932_v59 = vshra.s32 %v2559_v58, 16  ;;  %v747_v43 = vmin.f32 %v2573_v17, %v2575_v19 }
 0x101   :  { %58 = vst.msk [vmem:[#allocation3 + $0x20] sm:$0xff] %vm21_vm12, %v3858_v0  ;;  %v327_v2 = vpop.f32.mrf.mxu2 }
 0x102   :  { %59 = vst.msk [vmem:[#allocation3 + $0x28] sm:$0xff] %vm21_vm12, %v3858_v0  ;;  %v2577_v44 = vsel %vm636_vm5, %v327_v2, inf  ;;  %v440_v31 = vpop.f32.mrf.mxu3  ;;  %v2590_v42 = vcvt.s32.f32 %v932_v59 }
 0x103   :  { %60 = vst.msk [vmem:[#allocation3 + $0x30] sm:$0xff] %vm21_vm12, %v3858_v0  ;;  %v2582_v13 = vsel %vm637_vm6, %v440_v31, inf  ;;  %v2584_v50 = vpop.xlane.xlu0 %706  ;;  %v2607_v31 = vld [vmem:[#allocation2 + $0x88] sm:$0xff] }
 0x104   :  { %3861 = vst [vmem:[#allocation17_spill] sm:$0xff] %v2568_v55  ;;  %vm1508_vm7 = vcmp.lt.f32.partialorder %v2584_v50, %v2568_v55  ;;  %v795_v14 = vmin.f32 %v2577_v44, %v2582_v13  ;;  %vm803_vm2 = vcmp.eq.f32.partialorder %v2199_v26, %v2584_v50  ;;  %vm804_vm3 = vcmp.eq.f32.partialorder %v2201_v28, %v2584_v50 }
 0x105   :  { %61 = vst.msk [vmem:[#allocation3 + $0x38] sm:$0xff] %vm21_vm12, %v3858_v0  ;;  %v867_v26 = vsel %vm803_vm2, %v2503_v12, 256  ;;  %v868_v28 = vsel %vm804_vm3, %v2528_v8, 256 }
 0x106   :  { %3862 = vst [vmem:[#allocation18_spill] sm:$0xff] %v2575_v19  ;;  %935 = vmin.xlane.f32.xlu0 %v2590_v42  ;;  %796 = vmin.xlane.f32.xlu2 %v795_v14 }
 0x107   :  { %62 = vst.msk [vmem:[#allocation3 + $0x40] sm:$0xff] %vm21_vm12, %v3858_v0  ;;  %748 = vmin.xlane.f32.xlu1 %v747_v43 }
 0x108   :  { %3863 = vst [vmem:[#allocation19_spill] sm:$0xff] %v2584_v50 }
 0x109   :  { %63 = vst.msk [vmem:[#allocation3 + $0x48] sm:$0xff] %vm21_vm12, %v3858_v0 }
 0x10a   :  { %3864 = vst [vmem:[#allocation20_spill] sm:$0xff] %v2590_v42 }
 0x10b   :  { %64 = vst.msk [vmem:[#allocation3 + $0x50] sm:$0xff] %vm21_vm12, %v3858_v0  ;;  %v2615_v2 = vpop.xlane.xlu0 %754  ;;  %v2617_v59 = vpop.xlane.xlu1 %709 }
 0x10c   :  { %65 = vst.msk [vmem:[#allocation3 + $0x58] sm:$0xff] %vm21_vm12, %v3858_v0  ;;  %vm835_vm8 = vcmp.eq.f32.partialorder %v2211_v35, %v2615_v2  ;;  %vm836_vm9 = vcmp.eq.f32.partialorder %v2213_v36, %v2615_v2  ;;  %vm1524_vm10 = vcmp.lt.f32.partialorder %v2615_v2, %v2607_v31  ;;  %vm805_vm11 = vcmp.eq.f32.partialorder %v2216_v38, %v2617_v59 }
 0x10d   :  { %66 = vst.msk [vmem:[#allocation3 + $0x60] sm:$0xff] %vm21_vm12, %v3858_v0  ;;  %vm806_vm13 = vcmp.eq.f32.partialorder %v2219_v40, %v2617_v59  ;;  %vm1509_vm14 = vcmp.lt.f32.partialorder %v2617_v59, %v2611_v16  ;;  %v899_v35 = vsel %vm835_vm8, %v2503_v12, 256  ;;  %v900_v36 = vsel %vm836_vm9, %v2528_v8, 256 }
 0x10e   :  { %67 = vst.msk [vmem:[#allocation3 + $0x68] sm:$0xff] %vm21_vm12, %v3858_v0  ;;  %v869_v14 = vsel %vm805_vm11, %v2503_v12, 256  ;;  %v870_v43 = vsel %vm806_vm13, %v2528_v8, 256  ;;  %vm1201_vm15 = vcmp.lt.s32.totalorder %v899_v35, %v900_v36  ;;  %vm945_vm8 = vcmp.lt.s32.totalorder %v867_v26, %v868_v28 }
 0x10f   :  { %68 = vst.msk [vmem:[#allocation3 + $0x70] sm:$0xff] %vm21_vm12, %v3858_v0  ;;  %vm961_vm0 = vcmp.lt.s32.totalorder %v869_v14, %v870_v43  ;;  %v2645_v38 = vsel %vm1201_vm15, %v899_v35, %v900_v36 }
 0x110   :  { %3865 = vst [vmem:[#allocation21_spill] sm:$0xff] %v2607_v31  ;;  %v2647_v40 = vsel %vm961_vm0, %v869_v14, %v870_v43  ;;  %v1204_v42 = vshra.s32 %v2645_v38, 16  ;;  %v2671_v14 = vld [vmem:[#allocation2 + $0x80] sm:$0xff]  ;;  %v1685_v43 = vmin.f32 %v2607_v31, %v2615_v2 }
 0x111   :  { %69 = vst.msk [vmem:[#allocation3 + $0x78] sm:$0xff] %vm21_vm12, %v3858_v0  ;;  %v964_v19 = vshra.s32 %v2647_v40, 16 }
 0x112   :  { %3866 = vst [vmem:[#allocation22_spill] sm:$0xff] %v2611_v16  ;;  %v2661_v35 = vcvt.s32.f32 %v1204_v42 }
 0x113   :  { %70 = vst.msk [vmem:[#allocation3 + $0x80] sm:$0xff] %vm21_vm12, %v3858_v0  ;;  %v2663_v36 = vcvt.s32.f32 %v964_v19  ;;  %v1669_v19 = vmin.f32 %v2568_v55, %v2584_v50  ;;  %v1670_v55 = vmin.f32 %v2611_v16, %v2617_v59  ;;  %v2711_v16 = vld [vmem:[#allocation2 + $0x90] sm:$0xff] }
 0x114   :  { %3867 = vst [vmem:[#allocation23_spill] sm:$0xff] %v2615_v2  ;;  %1207 = vmin.xlane.f32.xlu0 %v2661_v35  ;;  %v2708_v2 = vsel %vm945_vm8, %v867_v26, %v868_v28 }
 0x115   :  { %3868 = vst [vmem:[#allocation24_spill] sm:$0xff] %v2617_v59  ;;  %967 = vmin.xlane.f32.xlu1 %v2663_v36 }
 0x116   :  { %71 = vst.msk [vmem:[#allocation3 + $0x88] sm:$0xff] %vm21_vm12, %v3858_v0 }
 0x117   :  { %72 = vst.msk [vmem:[#allocation3 + $0x90] sm:$0xff] %vm21_vm12, %v3858_v0  ;;  %v2681_v42 = vpop.xlane.xlu2 %751 }
 0x118   :  { %73 = vst.msk [vmem:[#allocation3 + $0x98] sm:$0xff] %vm21_vm12, %v3858_v0  ;;  %vm833_vm4 = vcmp.eq.f32.partialorder %v2233_v52, %v2681_v42  ;;  %vm834_vm5 = vcmp.eq.f32.partialorder %v2235_v53, %v2681_v42  ;;  %vm1523_vm6 = vcmp.lt.f32.partialorder %v2681_v42, %v2671_v14  ;;  %v1684_v52 = vmin.f32 %v2671_v14, %v2681_v42 }
 0x119   :  { %74 = vst.msk [vmem:[#allocation3 + $0xa0] sm:$0xff] %vm21_vm12, %v3858_v0  ;;  %v897_v50 = vsel %vm833_vm4, %v2503_v12, 256 }
 0x11a   :  { %75 = vst.msk [vmem:[#allocation3 + $0xa8] sm:$0xff] %vm21_vm12, %v3858_v0 }
 0x11b   :  { %76 = vst.msk [vmem:[#allocation3 + $0xb0] sm:$0xff] %vm21_vm12, %v3858_v0 }
 0x11c   :  { %77 = vst.msk [vmem:[#allocation3 + $0xb8] sm:$0xff] %vm21_vm12, %v3858_v0 }
 0x11d   :  { %78 = vst.msk [vmem:[#allocation3 + $0xc0] sm:$0xff] %vm21_vm12, %v3858_v0 }
 0x11e   :  { %3869 = vst [vmem:[#allocation25_spill] sm:$0xff] %v2661_v35  ;;  %v898_v35 = vsel %vm834_vm5, %v2528_v8, 256 }
 0x11f   :  { %79 = vst.msk [vmem:[#allocation3 + $0xc8] sm:$0xff] %vm21_vm12, %v3858_v0  ;;  %vm1185_vm9 = vcmp.lt.s32.totalorder %v897_v50, %v898_v35 }
 0x120   :  { %80 = vst.msk [vmem:[#allocation3 + $0xd0] sm:$0xff] %vm21_vm12, %v3858_v0  ;;  %v2704_v53 = vsel %vm1185_vm9, %v897_v50, %v898_v35  ;;  %v2720_v50 = vpop.xlane.xlu2 %712  ;;  %v2722_v35 = vld [vmem:[#allocation2 + $0xa0] sm:$0xff] }
 0x121   :  { %3870 = vst [vmem:[#allocation26_spill] sm:$0xff] %v2671_v14  ;;  %v1188_v31 = vshra.s32 %v2704_v53, 16  ;;  %vm807_vm0 = vcmp.eq.f32.partialorder %v2243_v60, %v2720_v50  ;;  %vm808_vm2 = vcmp.eq.f32.partialorder %v2245_v61, %v2720_v50  ;;  %v2742_v26 = vpop.xlane.xlu0 %763 }
 0x122   :  { %81 = vst.msk [vmem:[#allocation3 + $0xd8] sm:$0xff] %vm21_vm12, %v3858_v0  ;;  %vm841_vm4 = vcmp.eq.f32.partialorder %v2254_v6, %v2742_v26  ;;  %vm842_vm5 = vcmp.eq.f32.partialorder %v2261_v11, %v2742_v26  ;;  %v1688_v60 = vmin.f32 %v2722_v35, %v2742_v26  ;;  %v871_v61 = vsel %vm807_vm0, %v2503_v12, 256 }
 0x123   :  { %82 = vst.msk [vmem:[#allocation3 + $0xe0] sm:$0xff] %vm21_vm12, %v3858_v0  ;;  %v2716_v14 = vcvt.s32.f32 %v1188_v31  ;;  %v872_v28 = vsel %vm808_vm2, %v2528_v8, 256 }
 0x124   :  { %3871 = vst [vmem:[#allocation27_spill] sm:$0xff] %v2681_v42  ;;  %v2718_v42 = vpop.xlane.xlu1 %757  ;;  %vm977_vm9 = vcmp.lt.s32.totalorder %v871_v61, %v872_v28 }
 0x125   :  { %83 = vst.msk [vmem:[#allocation3 + $0xe8] sm:$0xff] %vm21_vm12, %v3858_v0  ;;  %vm837_vm11 = vcmp.eq.f32.partialorder %v2250_v4, %v2718_v42  ;;  %vm838_vm13 = vcmp.eq.f32.partialorder %v2252_v5, %v2718_v42  ;;  %vm1525_vm15 = vcmp.lt.f32.partialorder %v2718_v42, %v2711_v16  ;;  %1191 = vmin.xlane.f32.xlu2 %v2716_v14 }
 0x126   :  { %84 = vst.msk [vmem:[#allocation3 + $0xf0] sm:$0xff] %vm21_vm12, %v3858_v0  ;;  %v901_v6 = vsel %vm837_vm11, %v2503_v12, 256  ;;  %v902_v11 = vsel %vm838_vm13, %v2528_v8, 256 }
 0x127   :  { %85 = vst.msk [vmem:[#allocation3 + $0xf8] sm:$0xff] %vm21_vm12, %v3858_v0  ;;  %v2714_v0 = vld [vmem:[#allocation2 + $0x18] sm:$0xff]  ;;  %vm1217_vm8 = vcmp.lt.s32.totalorder %v901_v6, %v902_v11 }
 0x128   :  { %1701 = vst.msk [vmem:[#allocation2 + $0x8] sm:$0xff] %vm21_vm12, %v1669_v19  ;;  %v948_v19 = vshra.s32 %v2708_v2, 16  ;;  %vm1510_vm3 = vcmp.lt.f32.partialorder %v2720_v50, %v2714_v0  ;;  %v1671_v31 = vmin.f32 %v2714_v0, %v2720_v50 }
 0x129   :  { %1717 = vst.msk [vmem:[#allocation2 + $0x88] sm:$0xff] %vm21_vm12, %v1685_v43  ;;  %v905_v43 = vsel %vm841_vm4, %v2503_v12, 256 }
 0x12a   :  { %1702 = vst.msk [vmem:[#allocation2 + $0x10] sm:$0xff] %vm21_vm12, %v1670_v55  ;;  %v1686_v55 = vmin.f32 %v2711_v16, %v2718_v42  ;;  %v2773_v4 = vcvt.s32.f32 %v948_v19 }
 0x12b   :  { %3872 = vst [vmem:[#allocation28_spill] sm:$0xff] %v2711_v16  ;;  %v2779_v16 = vpop.xlane.xlu2 %760 }
 0x12c   :  { %1716 = vst.msk [vmem:[#allocation2 + $0x80] sm:$0xff] %vm21_vm12, %v1684_v52  ;;  %v906_v52 = vsel %vm842_vm5, %v2528_v8, 256  ;;  %vm839_vm13 = vcmp.eq.f32.partialorder %v2267_v23, %v2779_v16  ;;  %vm840_vm0 = vcmp.eq.f32.partialorder %v2269_v24, %v2779_v16 }
 0x12d   :  { %3873 = vst [vmem:[#allocation29_spill] sm:$0xff] %v2714_v0  ;;  %vm1249_vm11 = vcmp.lt.s32.totalorder %v905_v43, %v906_v52  ;;  %951 = vmin.xlane.f32.xlu2 %v2773_v4  ;;  %v903_v24 = vsel %vm839_vm13, %v2503_v12, 256 }
 0x12e   :  { %3874 = vst [vmem:[#allocation30_spill] sm:$0xff] %v2718_v42  ;;  %v2781_v42 = vld [vmem:[#allocation2 + $0xa8] sm:$0xff] }
 0x12f   :  { %3875 = vst [vmem:[#allocation31_spill] sm:$0xff] %v2720_v50  ;;  %v3168_v50 = vld [vmem:[#allocation2 + $0x68] sm:$0xff] }
 0x130   :  { %3876 = vst [vmem:[#allocation32_spill] sm:$0xff] %v2722_v35  ;;  %v2771_v35 = vsel %vm1217_vm8, %v901_v6, %v902_v11  ;;  %v2797_v6 = vpop.xlane.xlu0 %718 }
 0x131   :  { %3877 = vst [vmem:[#allocation33_spill] sm:$0xff] %v2742_v26  ;;  %v1220_v26 = vshra.s32 %v2771_v35, 16 }
 0x132   :  { %1718 = vst.msk [vmem:[#allocation2 + $0x90] sm:$0xff] %vm21_vm12, %v1686_v55  ;;  %v2767_v55 = vld [vmem:[#allocation2 + $0x98] sm:$0xff] }
 0x133   :  { %1703 = vst.msk [vmem:[#allocation2 + $0x18] sm:$0xff] %vm21_vm12, %v1671_v31  ;;  %v2769_v31 = vsel %vm977_vm9, %v871_v61, %v872_v28  ;;  %v1687_v19 = vmin.f32 %v2767_v55, %v2779_v16  ;;  %v2792_v61 = vld [vmem:[#allocation2 + $0x28] sm:$0xff]  ;;  %v2795_v28 = vpop.xlane.xlu1 %766  ;;  %v2801_v23 = vcvt.s32.f32 %v1220_v26  ;;  %vm811_vm9 = vcmp.eq.f32.partialorder %v2277_v25, %v2797_v6 }
 0x134   :  { %1720 = vst.msk [vmem:[#allocation2 + $0xa0] sm:$0xff] %vm21_vm12, %v1688_v60  ;;  %v980_v5 = vshra.s32 %v2769_v31, 16  ;;  %v2777_v60 = vsel %vm1249_vm11, %v905_v43, %v906_v52  ;;  %v904_v43 = vsel %vm840_vm0, %v2528_v8, 256  ;;  %vm843_vm4 = vcmp.eq.f32.partialorder %v2281_v30, %v2795_v28 }
 0x135   :  { %3878 = vst [vmem:[#allocation34_spill] sm:$0xff] %v2767_v55  ;;  %v1252_v0 = vshra.s32 %v2777_v60, 16  ;;  %vm844_vm5 = vcmp.eq.f32.partialorder %v2285_v37, %v2795_v28  ;;  %v1689_v52 = vmin.f32 %v2781_v42, %v2795_v28  ;;  %vm812_vm11 = vcmp.eq.f32.partialorder %v2279_v27, %v2797_v6  ;;  %1223 = vmin.xlane.f32.xlu1 %v2801_v23  ;;  %v2828_v27 = vld [vmem:[#allocation2 + $0x20] sm:$0xff] }
 0x136   :  { %3879 = vst [vmem:[#allocation35_spill] sm:$0xff] %v2779_v16  ;;  %v2799_v11 = vcvt.s32.f32 %v980_v5  ;;  %v1673_v26 = vmin.f32 %v2792_v61, %v2797_v6  ;;  %vm1233_vm0 = vcmp.lt.s32.totalorder %v903_v24, %v904_v43  ;;  %v875_v5 = vsel %vm811_vm9, %v2503_v12, 256 }
 0x137   :  { %3880 = vst [vmem:[#allocation36_spill] sm:$0xff] %v2781_v42  ;;  %v876_v25 = vsel %vm812_vm11, %v2528_v8, 256  ;;  %v907_v42 = vsel %vm843_vm4, %v2503_v12, 256 }
 0x138   :  { %3881 = vst [vmem:[#allocation37_spill] sm:$0xff] %v2792_v61  ;;  %983 = vmin.xlane.f32.xlu0 %v2799_v11  ;;  %vm1009_vm8 = vcmp.lt.s32.totalorder %v875_v5, %v876_v25 }
 0x139   :  { %3882 = vst [vmem:[#allocation38_spill] sm:$0xff] %v2795_v28 }
 0x13a   :  { %3883 = vst [vmem:[#allocation39_spill] sm:$0xff] %v2797_v6  ;;  %v2841_v6 = vsel %vm1009_vm8, %v875_v5, %v876_v25 }
 0x13b   :  { %1719 = vst.msk [vmem:[#allocation2 + $0x98] sm:$0xff] %vm21_vm12, %v1687_v19  ;;  %v2830_v19 = vsel %vm1233_vm0, %v903_v24, %v904_v43  ;;  %v2845_v24 = vld [vmem:[#allocation2 + $0x30] sm:$0xff]  ;;  %v2847_v43 = vcvt.s32.f32 %v1252_v0  ;;  %v1012_v55 = vshra.s32 %v2841_v6, 16  ;;  %v2860_v5 = vpop.xlane.xlu1 %721 }
 0x13c   :  { %1721 = vst.msk [vmem:[#allocation2 + $0xa8] sm:$0xff] %vm21_vm12, %v1689_v52  ;;  %v908_v52 = vsel %vm844_vm5, %v2528_v8, 256  ;;  %v1236_v61 = vshra.s32 %v2830_v19, 16  ;;  %vm813_vm11 = vcmp.eq.f32.partialorder %v2303_v47, %v2860_v5  ;;  %vm814_vm0 = vcmp.eq.f32.partialorder %v2305_v48, %v2860_v5  ;;  %v2885_v48 = vld [vmem:[#allocation2 + $0xb0] sm:$0xff] }
 0x13d   :  { %1705 = vst.msk [vmem:[#allocation2 + $0x28] sm:$0xff] %vm21_vm12, %v1673_v26  ;;  %vm1265_vm9 = vcmp.lt.s32.totalorder %v907_v42, %v908_v52  ;;  %v2843_v26 = vpop.xlane.xlu2 %715  ;;  %v2864_v25 = vcvt.s32.f32 %v1012_v55  ;;  %v878_v55 = vsel %vm814_vm0, %v2528_v8, 256 }
 0x13e   :  { %3884 = vst [vmem:[#allocation40_spill] sm:$0xff] %v2828_v27  ;;  %v2850_v30 = vsel %vm1265_vm9, %v907_v42, %v908_v52  ;;  %vm809_vm4 = vcmp.eq.f32.partialorder %v2295_v45, %v2843_v26  ;;  %vm810_vm5 = vcmp.eq.f32.partialorder %v2297_v46, %v2843_v26  ;;  %v1672_v37 = vmin.f32 %v2828_v27, %v2843_v26  ;;  %v2894_v27 = vld [vmem:[#allocation2 + $0xb8] sm:$0xff] }
 0x13f   :  { %3885 = vst [vmem:[#allocation41_spill] sm:$0xff] %v2843_v26  ;;  %v2862_v0 = vcvt.s32.f32 %v1236_v61  ;;  %v873_v42 = vsel %vm809_vm4, %v2503_v12, 256  ;;  %v874_v52 = vsel %vm810_vm5, %v2528_v8, 256  ;;  %v1674_v45 = vmin.f32 %v2845_v24, %v2860_v5  ;;  %1015 = vmin.xlane.f32.xlu1 %v2864_v25 }
 0x140   :  { %3886 = vst [vmem:[#allocation42_spill] sm:$0xff] %v2845_v24  ;;  %1255 = vmin.xlane.f32.xlu0 %v2847_v43  ;;  %vm993_vm4 = vcmp.lt.s32.totalorder %v873_v42, %v874_v52  ;;  %v877_v46 = vsel %vm813_vm11, %v2503_v12, 256  ;;  %v1268_v28 = vshra.s32 %v2850_v30, 16 }
 0x141   :  { %3887 = vst [vmem:[#allocation43_spill] sm:$0xff] %v2860_v5  ;;  %1239 = vmin.xlane.f32.xlu2 %v2862_v0  ;;  %v2883_v47 = vsel %vm993_vm4, %v873_v42, %v874_v52  ;;  %vm1025_vm5 = vcmp.lt.s32.totalorder %v877_v46, %v878_v55  ;;  %v2906_v52 = vpop.xlane.xlu0 %772 }
 0x142   :  { %1704 = vst.msk [vmem:[#allocation2 + $0x20] sm:$0xff] %vm21_vm12, %v1672_v37  ;;  %v996_v61 = vshra.s32 %v2883_v47, 16  ;;  %v2888_v37 = vsel %vm1025_vm5, %v877_v46, %v878_v55  ;;  %v2910_v55 = vcvt.s32.f32 %v1268_v28  ;;  %vm847_vm5 = vcmp.eq.f32.partialorder %v2318_v3, %v2906_v52 }
 0x143   :  { %1706 = vst.msk [vmem:[#allocation2 + $0x30] sm:$0xff] %vm21_vm12, %v1674_v45  ;;  %v1028_v24 = vshra.s32 %v2888_v37, 16  ;;  %vm848_vm4 = vcmp.eq.f32.partialorder %v2323_v10, %v2906_v52  ;;  %v2931_v10 = vld [vmem:[#allocation2 + $0x38] sm:$0xff] }
 0x144   :  { %3888 = vst [vmem:[#allocation44_spill] sm:$0xff] %v2885_v48  ;;  %v2896_v45 = vcvt.s32.f32 %v996_v61  ;;  %v912_v28 = vsel %vm848_vm4, %v2528_v8, 256 }
 0x145   :  { %v2892_v5 = vpop.xlane.xlu2 %769  ;;  %3890 = vst [vmem:[#allocation46_spill] sm:$0xff] %v2894_v27  ;;  %v2908_v46 = vcvt.s32.f32 %v1028_v24 }
 0x146   :  { %3889 = vst [vmem:[#allocation45_spill] sm:$0xff] %v2892_v5  ;;  %vm845_vm11 = vcmp.eq.f32.partialorder %v2313_v22, %v2892_v5  ;;  %vm846_vm0 = vcmp.eq.f32.partialorder %v2315_v63, %v2892_v5  ;;  %v1690_v42 = vmin.f32 %v2885_v48, %v2892_v5  ;;  %v1691_v22 = vmin.f32 %v2894_v27, %v2906_v52  ;;  %v2939_v48 = vld [vmem:[#allocation2 + $0xc0] sm:$0xff] }
 0x147   :  { %3891 = vst [vmem:[#allocation47_spill] sm:$0xff] %v2906_v52  ;;  %v909_v61 = vsel %vm845_vm11, %v2503_v12, 256  ;;  %v910_v26 = vsel %vm846_vm0, %v2528_v8, 256  ;;  %v911_v63 = vsel %vm847_vm5, %v2503_v12, 256  ;;  %1271 = vmin.xlane.f32.xlu1 %v2910_v55 }
 0x148   :  { %1722 = vst.msk [vmem:[#allocation2 + $0xb0] sm:$0xff] %vm21_vm12, %v1690_v42  ;;  %1031 = vmin.xlane.f32.xlu0 %v2908_v46  ;;  %vm1281_vm11 = vcmp.lt.s32.totalorder %v909_v61, %v910_v26  ;;  %vm1297_vm0 = vcmp.lt.s32.totalorder %v911_v63, %v912_v28 }
 0x149   :  { %999 = vmin.xlane.f32.xlu2 %v2896_v45  ;;  %1723 = vst.msk [vmem:[#allocation2 + $0xb8] sm:$0xff] %vm21_vm12, %v1691_v22  ;;  %v2929_v3 = vsel %vm1281_vm11, %v909_v61, %v910_v26  ;;  %v2934_v42 = vsel %vm1297_vm0, %v911_v63, %v912_v28  ;;  %v2951_v61 = vld [vmem:[#allocation2 + $0x40] sm:$0xff]  ;;  %v2953_v22 = vpop.xlane.xlu1 %775  ;;  %v2955_v63 = vpop.xlane.xlu0 %727 }
 0x14a   :  { %3892 = vst [vmem:[#allocation48_spill] sm:$0xff] %v2931_v10  ;;  %v1284_v24 = vshra.s32 %v2929_v3, 16  ;;  %v1300_v27 = vshra.s32 %v2934_v42, 16  ;;  %vm849_vm0 = vcmp.eq.f32.partialorder %v2344_v62, %v2953_v22  ;;  %vm850_vm11 = vcmp.eq.f32.partialorder %v2349_v49, %v2953_v22 }
 0x14b   :  { %3894 = vst [vmem:[#allocation50_spill] sm:$0xff] %v2939_v48  ;;  %vm817_vm8 = vcmp.eq.f32.partialorder %v2339_v34, %v2955_v63  ;;  %v1676_v62 = vmin.f32 %v2951_v61, %v2955_v63 }
 0x14c   :  { %v2941_v5 = vcvt.s32.f32 %v1284_v24  ;;  %3895 = vst [vmem:[#allocation51_spill] sm:$0xff] %v2951_v61  ;;  %v2957_v28 = vcvt.s32.f32 %v1300_v27  ;;  %v881_v27 = vsel %vm817_vm8, %v2503_v12, 256 }
 0x14d   :  { %v2937_v52 = vpop.xlane.xlu2 %724  ;;  %3896 = vst [vmem:[#allocation52_spill] sm:$0xff] %v2953_v22 }
 0x14e   :  { %3893 = vst [vmem:[#allocation49_spill] sm:$0xff] %v2937_v52  ;;  %vm815_vm4 = vcmp.eq.f32.partialorder %v2331_v29, %v2937_v52  ;;  %vm816_vm5 = vcmp.eq.f32.partialorder %v2333_v33, %v2937_v52  ;;  %v1675_v26 = vmin.f32 %v2931_v10, %v2937_v52  ;;  %v1692_v33 = vmin.f32 %v2939_v48, %v2953_v22  ;;  %v2997_v52 = vld [vmem:[#allocation2 + $0x48] sm:$0xff] }
 0x14f   :  { %3897 = vst [vmem:[#allocation53_spill] sm:$0xff] %v2955_v63  ;;  %v879_v24 = vsel %vm815_vm4, %v2503_v12, 256  ;;  %v880_v29 = vsel %vm816_vm5, %v2528_v8, 256  ;;  %vm818_vm4 = vcmp.eq.f32.partialorder %v2341_v39, %v2955_v63  ;;  %v914_v48 = vsel %vm850_vm11, %v2528_v8, 256  ;;  %v2994_v63 = vld [vmem:[#allocation2 + $0xc8] sm:$0xff] }
 0x150   :  { %1707 = vst.msk [vmem:[#allocation2 + $0x38] sm:$0xff] %vm21_vm12, %v1675_v26  ;;  %1303 = vmin.xlane.f32.xlu0 %v2957_v28  ;;  %vm1041_vm9 = vcmp.lt.s32.totalorder %v879_v24, %v880_v29  ;;  %v882_v34 = vsel %vm818_vm4, %v2528_v8, 256  ;;  %v913_v26 = vsel %vm849_vm0, %v2503_v12, 256 }
 0x151   :  { %1287 = vmin.xlane.f32.xlu2 %v2941_v5  ;;  %1724 = vst.msk [vmem:[#allocation2 + $0xc0] sm:$0xff] %vm21_vm12, %v1692_v33  ;;  %v2985_v39 = vsel %vm1041_vm9, %v879_v24, %v880_v29  ;;  %vm1057_vm5 = vcmp.lt.s32.totalorder %v881_v27, %v882_v34  ;;  %vm1313_vm13 = vcmp.lt.s32.totalorder %v913_v26, %v914_v48  ;;  %v3003_v29 = vpop.xlane.xlu1 %730 }
 0x152   :  { %1708 = vst.msk [vmem:[#allocation2 + $0x40] sm:$0xff] %vm21_vm12, %v1676_v62  ;;  %v1044_v33 = vshra.s32 %v2985_v39, 16  ;;  %v2992_v61 = vsel %vm1057_vm5, %v881_v27, %v882_v34  ;;  %v3007_v49 = vsel %vm1313_vm13, %v913_v26, %v914_v48  ;;  %vm819_vm0 = vcmp.eq.f32.partialorder %v2359_v56, %v3003_v29 }
 0x153   :  { %3898 = vst [vmem:[#allocation54_spill] sm:$0xff] %v2994_v63  ;;  %v1060_v10 = vshra.s32 %v2992_v61, 16  ;;  %vm820_vm4 = vcmp.eq.f32.partialorder %v2361_v57, %v3003_v29  ;;  %v883_v56 = vsel %vm819_vm0, %v2503_v12, 256 }
 0x154   :  { %3899 = vst [vmem:[#allocation55_spill] sm:$0xff] %v2997_v52  ;;  %v2999_v62 = vcvt.s32.f32 %v1044_v33  ;;  %v884_v57 = vsel %vm820_vm4, %v2528_v8, 256  ;;  %v3038_v33 = vld [vmem:[#allocation2 + $0xd0] sm:$0xff] }
 0x155   :  { %v3001_v24 = vpop.xlane.xlu2 %778  ;;  %3901 = vst [vmem:[#allocation57_spill] sm:$0xff] %v3003_v29  ;;  %v3005_v16 = vcvt.s32.f32 %v1060_v10  ;;  %vm1073_vm13 = vcmp.lt.s32.totalorder %v883_v56, %v884_v57  ;;  %v1316_v10 = vshra.s32 %v3007_v49, 16 }
 0x156   :  { %3900 = vst [vmem:[#allocation56_spill] sm:$0xff] %v3001_v24  ;;  %vm851_vm8 = vcmp.eq.f32.partialorder %v2364_v1, %v3001_v24  ;;  %vm852_vm9 = vcmp.eq.f32.partialorder %v2367_v9, %v3001_v24  ;;  %v1693_v27 = vmin.f32 %v2994_v63, %v3001_v24  ;;  %v1677_v1 = vmin.f32 %v2997_v52, %v3003_v29  ;;  %v3042_v52 = vld [vmem:[#allocation2 + $0x50] sm:$0xff]  ;;  %v3044_v29 = vpop.xlane.xlu0 %781 }
 0x157   :  { %1063 = vmin.xlane.f32.xlu1 %v3005_v16  ;;  %v915_v9 = vsel %vm851_vm8, %v2503_v12, 256  ;;  %v916_v48 = vsel %vm852_vm9, %v2528_v8, 256  ;;  %v3036_v26 = vsel %vm1073_vm13, %v883_v56, %v884_v57  ;;  %3902 = vst [vmem:[#allocation58_spill] sm:$0xff] %v3038_v33  ;;  %vm853_vm8 = vcmp.eq.f32.partialorder %v2382_v51, %v3044_v29 }
 0x158   :  { %1725 = vst.msk [vmem:[#allocation2 + $0xc8] sm:$0xff] %vm21_vm12, %v1693_v27  ;;  %vm1329_vm5 = vcmp.lt.s32.totalorder %v915_v9, %v916_v48  ;;  %v1076_v22 = vshra.s32 %v3036_v26, 16  ;;  %vm854_vm9 = vcmp.eq.f32.partialorder %v2387_v54, %v3044_v29 }
 0x159   :  { %1047 = vmin.xlane.f32.xlu2 %v2999_v62  ;;  %1709 = vst.msk [vmem:[#allocation2 + $0x48] sm:$0xff] %vm21_vm12, %v1677_v1  ;;  %v3034_v34 = vsel %vm1329_vm5, %v915_v9, %v916_v48  ;;  %v3052_v9 = vcvt.s32.f32 %v1316_v10  ;;  %v1694_v48 = vmin.f32 %v3038_v33, %v3044_v29  ;;  %v3083_v10 = vld [vmem:[#allocation2 + $0xd8] sm:$0xff] }
 0x15a   :  { %v1332_v27 = vshra.s32 %v3034_v34, 16  ;;  %3903 = vst [vmem:[#allocation59_spill] sm:$0xff] %v3042_v52  ;;  %v3050_v24 = vcvt.s32.f32 %v1076_v22  ;;  %v918_v22 = vsel %vm854_vm9, %v2528_v8, 256  ;;  %v3087_v33 = vld [vmem:[#allocation2 + $0x58] sm:$0xff] }
 0x15b   :  { %3904 = vst [vmem:[#allocation60_spill] sm:$0xff] %v3044_v29  ;;  %v3089_v29 = vpop.xlane.xlu1 %784 }
 0x15c   :  { %v3048_v1 = vcvt.s32.f32 %v1332_v27  ;;  %1726 = vst.msk [vmem:[#allocation2 + $0xd0] sm:$0xff] %vm21_vm12, %v1694_v48  ;;  %1079 = vmin.xlane.f32.xlu0 %v3050_v24  ;;  %vm856_vm9 = vcmp.eq.f32.partialorder %v2421_v7, %v3089_v29 }
 0x15d   :  { %v3046_v63 = vpop.xlane.xlu2 %733  ;;  %3906 = vst [vmem:[#allocation62_spill] sm:$0xff] %v3083_v10 }
 0x15e   :  { %3905 = vst [vmem:[#allocation61_spill] sm:$0xff] %v3046_v63  ;;  %vm821_vm4 = vcmp.eq.f32.partialorder %v2378_v41, %v3046_v63  ;;  %vm822_vm13 = vcmp.eq.f32.partialorder %v2380_v21, %v3046_v63  ;;  %v1678_v51 = vmin.f32 %v3042_v52, %v3046_v63  ;;  %v917_v21 = vsel %vm853_vm8, %v2503_v12, 256  ;;  %v3091_v52 = vpop.xlane.xlu0 %736 }
 0x15f   :  { %1319 = vmin.xlane.f32.xlu1 %v3052_v9  ;;  %v885_v54 = vsel %vm821_vm4, %v2503_v12, 256  ;;  %v886_v41 = vsel %vm822_vm13, %v2528_v8, 256  ;;  %vm1345_vm5 = vcmp.lt.s32.totalorder %v917_v21, %v918_v22  ;;  %3907 = vst [vmem:[#allocation63_spill] sm:$0xff] %v3087_v33  ;;  %vm855_vm8 = vcmp.eq.f32.partialorder %v2416_v20, %v3089_v29 }
 0x160   :  { %1710 = vst.msk [vmem:[#allocation2 + $0x50] sm:$0xff] %vm21_vm12, %v1678_v51  ;;  %vm1089_vm0 = vcmp.lt.s32.totalorder %v885_v54, %v886_v41  ;;  %v3081_v57 = vsel %vm1345_vm5, %v917_v21, %v918_v22  ;;  %vm823_vm4 = vcmp.eq.f32.partialorder %v2409_v15, %v3091_v52  ;;  %vm824_vm13 = vcmp.eq.f32.partialorder %v2411_v18, %v3091_v52  ;;  %v3123_v22 = vld [vmem:[#allocation2 + $0xe0] sm:$0xff] }
 0x161   :  { %1335 = vmin.xlane.f32.xlu2 %v3048_v1  ;;  %v3079_v56 = vsel %vm1089_vm0, %v885_v54, %v886_v41  ;;  %v1348_v48 = vshra.s32 %v3081_v57, 16  ;;  %3908 = vst [vmem:[#allocation64_spill] sm:$0xff] %v3089_v29  ;;  %v1695_v54 = vmin.f32 %v3083_v10, %v3089_v29  ;;  %v1679_v20 = vmin.f32 %v3087_v33, %v3091_v52 }
 0x162   :  { %v1092_v27 = vshra.s32 %v3079_v56, 16  ;;  %3909 = vst [vmem:[#allocation65_spill] sm:$0xff] %v3091_v52  ;;  %v887_v7 = vsel %vm823_vm4, %v2503_v12, 256  ;;  %v888_v41 = vsel %vm824_vm13, %v2528_v8, 256  ;;  %v919_v15 = vsel %vm855_vm8, %v2503_v12, 256  ;;  %v3919_v52 = vld [vmem:[#allocation4_spill] sm:$0xff] }
 0x163   :  { %v3095_v51 = vcvt.s32.f32 %v1348_v48  ;;  %1727 = vst.msk [vmem:[#allocation2 + $0xd8] sm:$0xff] %vm21_vm12, %v1695_v54  ;;  %v920_v18 = vsel %vm856_vm9, %v2528_v8, 256  ;;  %vm1105_vm0 = vcmp.lt.s32.totalorder %v887_v7, %v888_v41  ;;  %v3126_v48 = vld [vmem:[#allocation2 + $0x60] sm:$0xff]  ;;  %v3130_v10 = vpop.xlane.xlu1 %739 }
 0x164   :  { %v3093_v63 = vcvt.s32.f32 %v1092_v27  ;;  %1711 = vst.msk [vmem:[#allocation2 + $0x58] sm:$0xff] %vm21_vm12, %v1679_v20  ;;  %v3121_v21 = vsel %vm1105_vm0, %v887_v7, %v888_v41  ;;  %vm1361_vm5 = vcmp.lt.s32.totalorder %v919_v15, %v920_v18  ;;  %v3917_v20 = vld [vmem:[#allocation6_spill] sm:$0xff]  ;;  %v3918_v7 = vld [vmem:[#allocation7_spill] sm:$0xff]  ;;  %vm825_vm4 = vcmp.eq.f32.partialorder %v3919_v52, %v3130_v10 }
 0x165   :  { %1351 = vmin.xlane.f32.xlu0 %v3095_v51  ;;  %3910 = vst [vmem:[#allocation66_spill] sm:$0xff] %v3121_v21  ;;  %v1108_v27 = vshra.s32 %v3121_v21, 16  ;;  %v3128_v54 = vpop.xlane.xlu2 %787  ;;  %v3134_v33 = vsel %vm1361_vm5, %v919_v15, %v920_v18  ;;  %v1680_v15 = vmin.f32 %v3126_v48, %v3130_v10 }
 0x166   :  { %3911 = vst [vmem:[#allocation67_spill] sm:$0xff] %v3123_v22  ;;  %vm857_vm8 = vcmp.eq.f32.partialorder %v3917_v20, %v3128_v54  ;;  %vm858_vm9 = vcmp.eq.f32.partialorder %v3918_v7, %v3128_v54  ;;  %v1696_v41 = vmin.f32 %v3123_v22, %v3128_v54  ;;  %v889_v7 = vsel %vm825_vm4, %v2503_v12, 256 }
 0x167   :  { %3912 = vst [vmem:[#allocation68_spill] sm:$0xff] %v3126_v48  ;;  %v3132_v29 = vcvt.s32.f32 %v1108_v27  ;;  %v3920_v27 = vld [vmem:[#allocation5_spill] sm:$0xff]  ;;  %v921_v18 = vsel %vm857_vm8, %v2503_v12, 256  ;;  %v922_v20 = vsel %vm858_vm9, %v2528_v8, 256 }
 0x168   :  { %3913 = vst [vmem:[#allocation69_spill] sm:$0xff] %v3128_v54  ;;  %vm826_vm13 = vcmp.eq.f32.partialorder %v3920_v27, %v3130_v10  ;;  %vm1377_vm0 = vcmp.lt.s32.totalorder %v921_v18, %v922_v20  ;;  %v1364_v27 = vshra.s32 %v3134_v33, 16 }
 0x169   :  { %1095 = vmin.xlane.f32.xlu2 %v3093_v63  ;;  %3914 = vst [vmem:[#allocation70_spill] sm:$0xff] %v3130_v10  ;;  %1111 = vmin.xlane.f32.xlu1 %v3132_v29  ;;  %v890_v52 = vsel %vm826_vm13, %v2528_v8, 256  ;;  %v3160_v22 = vsel %vm1377_vm0, %v921_v18, %v922_v20  ;;  %v3164_v10 = vld [vmem:[#allocation2 + $0xe8] sm:$0xff]  ;;  %v3170_v59 = vpop.xlane.xlu0 %790  ;;  %v3928_v20 = vld [vmem:[#allocation10_spill] sm:$0xff] }
 0x16a   :  { %3915 = vst [vmem:[#allocation71_spill] sm:$0xff] %v3132_v29  ;;  %vm1121_vm11 = vcmp.lt.s32.totalorder %v889_v7, %v890_v52  ;;  %v3178_v18 = vcvt.s32.f32 %v1364_v27 }
 0x16b   :  { %3916 = vst [vmem:[#allocation72_spill] sm:$0xff] %v3134_v33  ;;  %v3162_v48 = vsel %vm1121_vm11, %v889_v7, %v890_v52  ;;  %vm859_vm11 = vcmp.eq.f32.partialorder %v3928_v20, %v3170_v59  ;;  %v3929_v7 = vld [vmem:[#allocation11_spill] sm:$0xff]  ;;  %v1697_v52 = vmin.f32 %v3164_v10, %v3170_v59  ;;  %v3930_v33 = vld [vmem:[#allocation8_spill] sm:$0xff] }
 0x16c   :  { %1728 = vst.msk [vmem:[#allocation2 + $0xe0] sm:$0xff] %vm21_vm12, %v1696_v41  ;;  %v1380_v41 = vshra.s32 %v3160_v22, 16  ;;  %v1124_v54 = vshra.s32 %v3162_v48, 16  ;;  %vm860_vm8 = vcmp.eq.f32.partialorder %v3929_v7, %v3170_v59  ;;  %v923_v20 = vsel %vm859_vm11, %v2503_v12, 256 }
 0x16d   :  { %1712 = vst.msk [vmem:[#allocation2 + $0x60] sm:$0xff] %vm21_vm12, %v1680_v15  ;;  %v3172_v29 = vpop.xlane.xlu2 %742  ;;  %v924_v7 = vsel %vm860_vm8, %v2528_v8, 256 }
 0x16e   :  { %3921 = vst [vmem:[#allocation6_spill] sm:$0xff] %v3164_v10  ;;  %v3174_v15 = vcvt.s32.f32 %v1380_v41  ;;  %v3176_v21 = vcvt.s32.f32 %v1124_v54  ;;  %vm827_vm0 = vcmp.eq.f32.partialorder %v3930_v33, %v3172_v29  ;;  %v3931_v54 = vld [vmem:[#allocation9_spill] sm:$0xff]  ;;  %v1681_v27 = vmin.f32 %v3168_v50, %v3172_v29 }
 0x16f   :  { %3922 = vst [vmem:[#allocation7_spill] sm:$0xff] %v3168_v50  ;;  %vm828_vm4 = vcmp.eq.f32.partialorder %v3931_v54, %v3172_v29  ;;  %v891_v41 = vsel %vm827_vm0, %v2503_v12, 256  ;;  %vm1393_vm13 = vcmp.lt.s32.totalorder %v923_v20, %v924_v7 }
 0x170   :  { %3923 = vst [vmem:[#allocation4_spill] sm:$0xff] %v3170_v59  ;;  %1127 = vmin.xlane.f32.xlu0 %v3176_v21  ;;  %v892_v33 = vsel %vm828_vm4, %v2528_v8, 256  ;;  %v3207_v10 = vsel %vm1393_vm13, %v923_v20, %v924_v7  ;;  %v3939_v7 = vld [vmem:[#allocation14_spill] sm:$0xff] }
 0x171   :  { %3924 = vst [vmem:[#allocation5_spill] sm:$0xff] %v3172_v29  ;;  %1383 = vmin.xlane.f32.xlu2 %v3174_v15  ;;  %1367 = vmin.xlane.f32.xlu1 %v3178_v18  ;;  %vm1137_vm9 = vcmp.lt.s32.totalorder %v891_v41, %v892_v33  ;;  %v1396_v50 = vshra.s32 %v3207_v10, 16  ;;  %v3213_v29 = vld [vmem:[#allocation2 + $0xf0] sm:$0xff] }
 0x172   :  { %3925 = vst [vmem:[#allocation73_spill] sm:$0xff] %v3174_v15  ;;  %v3205_v54 = vsel %vm1137_vm9, %v891_v41, %v892_v33  ;;  %v3938_v41 = vld [vmem:[#allocation12_spill] sm:$0xff] }
 0x173   :  { %3926 = vst [vmem:[#allocation74_spill] sm:$0xff] %v3176_v21  ;;  %v1140_v59 = vshra.s32 %v3205_v54, 16  ;;  %v3219_v15 = vcvt.s32.f32 %v1396_v50 }
 0x174   :  { %3927 = vst [vmem:[#allocation75_spill] sm:$0xff] %v3178_v18  ;;  %v3215_v18 = vpop.xlane.xlu0 %745 }
 0x175   :  { %1729 = vst.msk [vmem:[#allocation2 + $0xe8] sm:$0xff] %vm21_vm12, %v1697_v52  ;;  %v3209_v52 = vld [vmem:[#allocation2 + $0x70] sm:$0xff]  ;;  %v3217_v21 = vcvt.s32.f32 %v1140_v59  ;;  %vm829_vm11 = vcmp.eq.f32.partialorder %v2511_v32, %v3215_v18  ;;  %vm830_vm8 = vcmp.eq.f32.partialorder %v3938_v41, %v3215_v18 }
 0x176   :  { %1713 = vst.msk [vmem:[#allocation2 + $0x68] sm:$0xff] %vm21_vm12, %v1681_v27  ;;  %v3221_v27 = vpop.xlane.xlu1 %793  ;;  %v1682_v33 = vmin.f32 %v3209_v52, %v3215_v18  ;;  %v893_v32 = vsel %vm829_vm11, %v2503_v12, 256  ;;  %v894_v50 = vsel %vm830_vm8, %v2528_v8, 256 }
 0x177   :  { %3932 = vst [vmem:[#allocation10_spill] sm:$0xff] %v3207_v10  ;;  %v1698_v59 = vmin.f32 %v3213_v29, %v3221_v27  ;;  %vm1153_vm4 = vcmp.lt.s32.totalorder %v893_v32, %v894_v50  ;;  %vm861_vm13 = vcmp.eq.f32.partialorder %v3939_v7, %v3221_v27 }
 0x178   :  { %3933 = vst [vmem:[#allocation11_spill] sm:$0xff] %v3209_v52  ;;  %1399 = vmin.xlane.f32.xlu0 %v3219_v15  ;;  %v3241_v20 = vsel %vm1153_vm4, %v893_v32, %v894_v50  ;;  %v3250_v52 = vld [vmem:[#allocation2 + $0x78] sm:$0xff]  ;;  %v931_v32 = vand.u32 65535, %v2559_v58  ;;  %v925_v50 = vsel %vm861_vm13, %v2503_v12, 256  ;;  %v3946_v58 = vld [vmem:[#allocation18_spill] sm:$0xff] }
 0x179   :  { %3934 = vst [vmem:[#allocation8_spill] sm:$0xff] %v3213_v29  ;;  %1143 = vmin.xlane.f32.xlu2 %v3217_v21  ;;  %v1156_v41 = vshra.s32 %v3241_v20, 16  ;;  %v3246_v29 = vld [vmem:[#allocation2 + $0xf8] sm:$0xff] }
 0x17a   :  { %3935 = vst [vmem:[#allocation9_spill] sm:$0xff] %v3215_v18 }
 0x17b   :  { %3936 = vst [vmem:[#allocation76_spill] sm:$0xff] %v3219_v15  ;;  %v3252_v18 = vcvt.s32.f32 %v1156_v41  ;;  %v3254_v15 = vpop.xlane.xlu2 %796 }
 0x17c   :  { %3937 = vst [vmem:[#allocation77_spill] sm:$0xff] %v3221_v27  ;;  %vm863_vm11 = vcmp.eq.f32.partialorder %v2577_v44, %v3254_v15  ;;  %vm864_vm8 = vcmp.eq.f32.partialorder %v2582_v13, %v3254_v15  ;;  %v1699_v7 = vmin.f32 %v3246_v29, %v3254_v15  ;;  %v3269_v41 = vpop.xlane.xlu0 %935 }
 0x17d   :  { %1714 = vst.msk [vmem:[#allocation2 + $0x70] sm:$0xff] %vm21_vm12, %v1682_v33  ;;  %v3941_v33 = vld [vmem:[#allocation15_spill] sm:$0xff]  ;;  %1159 = vmin.xlane.f32.xlu1 %v3252_v18 }
 0x17e   :  { %1730 = vst.msk [vmem:[#allocation2 + $0xf0] sm:$0xff] %vm21_vm12, %v1698_v59  ;;  %vm862_vm0 = vcmp.eq.f32.partialorder %v3941_v33, %v3221_v27  ;;  %v3256_v59 = vpop.xlane.xlu1 %748  ;;  %v3947_v33 = vld [vmem:[#allocation20_spill] sm:$0xff]  ;;  %v933_v27 = vcvt.s32.f32 %v931_v32 }
 0x17f   :  { %3940 = vst [vmem:[#allocation12_spill] sm:$0xff] %v3246_v29  ;;  %vm831_vm9 = vcmp.eq.f32.partialorder %v2573_v17, %v3256_v59  ;;  %vm832_vm13 = vcmp.eq.f32.partialorder %v3946_v58, %v3256_v59  ;;  %v926_v44 = vsel %vm862_vm0, %v2528_v8, 256  ;;  %v1683_v13 = vmin.f32 %v3250_v52, %v3256_v59 }
 0x180   :  { %3942 = vst [vmem:[#allocation14_spill] sm:$0xff] %v3250_v52  ;;  %v927_v29 = vsel %vm863_vm11, %v2503_v12, 256  ;;  %v928_v17 = vsel %vm864_vm8, %v2528_v8, 256  ;;  %v895_v58 = vsel %vm831_vm9, %v2503_v12, 256  ;;  %vm937_vm0 = vcmp.eq.f32.partialorder %v3947_v33, %v3269_v41 }
 0x181   :  { %3943 = vst [vmem:[#allocation15_spill] sm:$0xff] %v3252_v18  ;;  %vm1425_vm4 = vcmp.lt.s32.totalorder %v927_v29, %v928_v17  ;;  %vm1409_vm2 = vcmp.lt.s32.totalorder %v925_v50, %v926_v44  ;;  %v938_v12 = vsel %vm937_vm0, %v933_v27, inf }
 0x182   :  { %3944 = vst [vmem:[#allocation78_spill] sm:$0xff] %v3254_v15  ;;  %v896_v15 = vsel %vm832_vm13, %v2528_v8, 256  ;;  %v3289_v10 = vsel %vm1425_vm4, %v927_v29, %v928_v17  ;;  %v3299_v8 = vsel %vm1409_vm2, %v925_v50, %v926_v44  ;;  %v3948_v50 = vld [vmem:[#allocation25_spill] sm:$0xff]  ;;  %v1187_v44 = vand.u32 65535, %v2704_v53 }
 0x183   :  { %3945 = vst [vmem:[#allocation79_spill] sm:$0xff] %v3256_v59  ;;  %vm1169_vm5 = vcmp.lt.s32.totalorder %v895_v58, %v896_v15  ;;  %v1412_v32 = vshra.s32 %v3299_v8, 16  ;;  %v1219_v53 = vand.u32 65535, %v2771_v35 }
 0x184   :  { %1731 = vst.msk [vmem:[#allocation2 + $0xf8] sm:$0xff] %vm21_vm12, %v1699_v7  ;;  %v1428_v7 = vshra.s32 %v3289_v10, 16  ;;  %v3294_v52 = vsel %vm1169_vm5, %v895_v58, %v896_v15 }
 0x185   :  { %1715 = vst.msk [vmem:[#allocation2 + $0x78] sm:$0xff] %vm21_vm12, %v1683_v13  ;;  %v1172_v59 = vshra.s32 %v3294_v52, 16  ;;  %939 = vmin.xlane.f32.xlu1 %v938_v12  ;;  %v963_v13 = vand.u32 65535, %v2647_v40  ;;  %v3309_v58 = vcvt.s32.f32 %v1412_v32  ;;  %v1203_v40 = vand.u32 65535, %v2645_v38 }
 0x186   :  { %v3297_v18 = vcvt.s32.f32 %v1428_v7  ;;  %v947_v32 = vand.u32 65535, %v2708_v2  ;;  %v979_v38 = vand.u32 65535, %v2769_v31  ;;  %v1221_v2 = vcvt.s32.f32 %v1219_v53 }
 0x187   :  { %v3301_v29 = vcvt.s32.f32 %v1172_v59  ;;  %v965_v17 = vcvt.s32.f32 %v963_v13  ;;  %v3314_v59 = vpop.xlane.xlu0 %1207  ;;  %v1205_v33 = vcvt.s32.f32 %v1203_v40  ;;  %v1189_v13 = vcvt.s32.f32 %v1187_v44 }
 0x188   :  { %1431 = vmin.xlane.f32.xlu2 %v3297_v18  ;;  %v3307_v15 = vpop.xlane.xlu1 %967  ;;  %vm1209_vm5 = vcmp.eq.f32.partialorder %v3948_v50, %v3314_v59  ;;  %v981_v44 = vcvt.s32.f32 %v979_v38  ;;  %v1027_v53 = vand.u32 65535, %v2888_v37  ;;  %v1283_v37 = vand.u32 65535, %v2929_v3 }
 0x189   :  { %1175 = vmin.xlane.f32.xlu0 %v3301_v29  ;;  %vm969_vm2 = vcmp.eq.f32.partialorder %v2663_v36, %v3307_v15  ;;  %v1210_v7 = vsel %vm1209_vm5, %v1205_v33, inf  ;;  %v1235_v33 = vand.u32 65535, %v2830_v19  ;;  %v995_v19 = vand.u32 65535, %v2883_v47 }
 0x18a   :  { %v970_v27 = vsel %vm969_vm2, %v965_v17, inf  ;;  %v1043_v3 = vand.u32 65535, %v2985_v39  ;;  %v1331_v39 = vand.u32 65535, %v3034_v34 }
 0x18d   :  { %1415 = vmin.xlane.f32.xlu1 %v3309_v58 }
 0x190   :  { %971 = vmin.xlane.f32.xlu2 %v970_v27  ;;  %v949_v27 = vcvt.s32.f32 %v947_v32 }
 0x195   :  { %1211 = vmin.xlane.f32.xlu1 %v1210_v7  ;;  %v1011_v7 = vand.u32 65535, %v2841_v6 }
 0x198   :  { %v3320_v12 = vpop.xlane.xlu2 %1191 }
 0x199   :  { %vm1193_vm9 = vcmp.eq.f32.partialorder %v2716_v14, %v3320_v12 }
 0x19a   :  { %v1194_v36 = vsel %vm1193_vm9, %v1189_v13, inf }
 0x19b   :  { %1195 = vmin.xlane.f32.xlu0 %v1194_v36 }
 0x1a0   :  { %v3326_v17 = vpop.xlane.xlu2 %951 }
 0x1a1   :  { %vm953_vm11 = vcmp.eq.f32.partialorder %v2773_v4, %v3326_v17  ;;  %v1251_v4 = vand.u32 65535, %v2777_v60 }
 0x1a2   :  { %v954_v40 = vsel %vm953_vm11, %v949_v27, inf }
 0x1a3   :  { %955 = vmin.xlane.f32.xlu0 %v954_v40  ;;  %v1253_v32 = vcvt.s32.f32 %v1251_v4  ;;  %v1267_v40 = vand.u32 65535, %v2850_v30  ;;  %v1299_v4 = vand.u32 65535, %v2934_v42  ;;  %v1059_v42 = vand.u32 65535, %v2992_v61 }
 0x1a4   :  { %v1075_v61 = vand.u32 65535, %v3036_v26  ;;  %v1091_v26 = vand.u32 65535, %v3079_v56  ;;  %v3949_v56 = vld [vmem:[#allocation66_spill] sm:$0xff] }
 0x1a8   :  { %v3333_v14 = vpop.xlane.xlu1 %1223 }
 0x1a9   :  { %vm1225_vm4 = vcmp.eq.f32.partialorder %v2801_v23, %v3333_v14  ;;  %v1013_v23 = vcvt.s32.f32 %v1011_v7 }
 0x1aa   :  { %v1226_v35 = vsel %vm1225_vm4, %v1221_v2, inf  ;;  %v1029_v2 = vcvt.s32.f32 %v1027_v53  ;;  %v1333_v53 = vcvt.s32.f32 %v1331_v39  ;;  %v3953_v39 = vld [vmem:[#allocation74_spill] sm:$0xff] }
 0x1ab   :  { %v3331_v50 = vpop.xlane.xlu0 %983  ;;  %1227 = vmin.xlane.f32.xlu2 %v1226_v35 }
 0x1ac   :  { %vm985_vm8 = vcmp.eq.f32.partialorder %v2799_v11, %v3331_v50  ;;  %v1237_v11 = vcvt.s32.f32 %v1235_v33 }
 0x1ad   :  { %v986_v31 = vsel %vm985_vm8, %v981_v44, inf }
 0x1ae   :  { %987 = vmin.xlane.f32.xlu1 %v986_v31 }
 0x1b2   :  { %v3346_v38 = vpop.xlane.xlu1 %1015 }
 0x1b3   :  { %v3344_v36 = vpop.xlane.xlu0 %1255  ;;  %vm1017_vm2 = vcmp.eq.f32.partialorder %v2864_v25, %v3346_v38  ;;  %v1269_v25 = vcvt.s32.f32 %v1267_v40 }
 0x1b4   :  { %v3342_v13 = vpop.xlane.xlu2 %1239  ;;  %vm1257_vm13 = vcmp.eq.f32.partialorder %v2847_v43, %v3344_v36  ;;  %v1018_v6 = vsel %vm1017_vm2, %v1013_v23, inf  ;;  %v1045_v23 = vcvt.s32.f32 %v1043_v3 }
 0x1b5   :  { %vm1241_vm0 = vcmp.eq.f32.partialorder %v2862_v0, %v3342_v13  ;;  %v1258_v60 = vsel %vm1257_vm13, %v1253_v32, inf  ;;  %1019 = vmin.xlane.f32.xlu2 %v1018_v6  ;;  %v997_v0 = vcvt.s32.f32 %v995_v19  ;;  %v1315_v6 = vand.u32 65535, %v3007_v49 }
 0x1b6   :  { %v1242_v27 = vsel %vm1241_vm0, %v1237_v11, inf  ;;  %1259 = vmin.xlane.f32.xlu1 %v1258_v60 }
 0x1b7   :  { %1243 = vmin.xlane.f32.xlu0 %v1242_v27  ;;  %v1317_v34 = vcvt.s32.f32 %v1315_v6 }
 0x1ba   :  { %v3361_v31 = vpop.xlane.xlu1 %1271 }
 0x1bb   :  { %v3359_v44 = vpop.xlane.xlu0 %1031  ;;  %vm1273_vm11 = vcmp.eq.f32.partialorder %v2910_v55, %v3361_v31 }
 0x1bc   :  { %v3357_v43 = vpop.xlane.xlu2 %999  ;;  %vm1033_vm9 = vcmp.eq.f32.partialorder %v2908_v46, %v3359_v44  ;;  %v1274_v30 = vsel %vm1273_vm11, %v1269_v25, inf  ;;  %v1301_v46 = vcvt.s32.f32 %v1299_v4  ;;  %v1347_v25 = vand.u32 65535, %v3081_v57 }
 0x1bd   :  { %vm1001_vm5 = vcmp.eq.f32.partialorder %v2896_v45, %v3357_v43  ;;  %v1034_v35 = vsel %vm1033_vm9, %v1029_v2, inf  ;;  %1275 = vmin.xlane.f32.xlu2 %v1274_v30  ;;  %v1285_v45 = vcvt.s32.f32 %v1283_v37  ;;  %v1107_v37 = vand.u32 65535, %v3949_v56 }
 0x1be   :  { %v1002_v47 = vsel %vm1001_vm5, %v997_v0, inf  ;;  %1035 = vmin.xlane.f32.xlu1 %v1034_v35  ;;  %v1077_v0 = vcvt.s32.f32 %v1075_v61 }
 0x1bf   :  { %1003 = vmin.xlane.f32.xlu0 %v1002_v47  ;;  %v1109_v57 = vcvt.s32.f32 %v1107_v37 }
 0x1c3   :  { %v3373_v7 = vpop.xlane.xlu0 %1303 }
 0x1c4   :  { %v3371_v33 = vpop.xlane.xlu2 %1287  ;;  %vm1305_vm4 = vcmp.eq.f32.partialorder %v2957_v28, %v3373_v7 }
 0x1c5   :  { %vm1289_vm8 = vcmp.eq.f32.partialorder %v2941_v5, %v3371_v33  ;;  %v1306_v55 = vsel %vm1305_vm4, %v1301_v46, inf  ;;  %v1061_v5 = vcvt.s32.f32 %v1059_v42 }
 0x1c6   :  { %v1290_v32 = vsel %vm1289_vm8, %v1285_v45, inf  ;;  %1307 = vmin.xlane.f32.xlu1 %v1306_v55  ;;  %v3950_v45 = vld [vmem:[#allocation71_spill] sm:$0xff]  ;;  %v3951_v55 = vld [vmem:[#allocation72_spill] sm:$0xff] }
 0x1c7   :  { %1291 = vmin.xlane.f32.xlu0 %v1290_v32  ;;  %v1379_v32 = vand.u32 65535, %v3160_v22 }
 0x1c9   :  { %v1381_v42 = vcvt.s32.f32 %v1379_v32  ;;  %v1539_v32 = vld [vmem:[#allocation3] sm:$0xff] }
 0x1ca   :  { %v3383_v60 = vpop.xlane.xlu1 %1063 }
 0x1cb   :  { %vm1065_vm0 = vcmp.eq.f32.partialorder %v3005_v16, %v3383_v60 }
 0x1cc   :  { %v3381_v11 = vpop.xlane.xlu2 %1047  ;;  %v1066_v28 = vsel %vm1065_vm0, %v1061_v5, inf }
 0x1cd   :  { %vm1049_vm13 = vcmp.eq.f32.partialorder %v2999_v62, %v3381_v11  ;;  %1067 = vmin.xlane.f32.xlu2 %v1066_v28  ;;  %v3952_v28 = vld [vmem:[#allocation73_spill] sm:$0xff] }
 0x1ce   :  { %v1050_v27 = vsel %vm1049_vm13, %v1045_v23, inf }
 0x1cf   :  { %1051 = vmin.xlane.f32.xlu0 %v1050_v27  ;;  %v3394_v40 = vpop.xlane.xlu0 %1079 }
 0x1d0   :  { %vm1081_vm5 = vcmp.eq.f32.partialorder %v3050_v24, %v3394_v40  ;;  %v1349_v24 = vcvt.s32.f32 %v1347_v25 }
 0x1d1   :  { %v1082_v2 = vsel %vm1081_vm5, %v1077_v0, inf  ;;  %v1139_v0 = vand.u32 65535, %v3205_v54 }
 0x1d2   :  { %v3396_v62 = vpop.xlane.xlu1 %1319  ;;  %1083 = vmin.xlane.f32.xlu1 %v1082_v2 }
 0x1d3   :  { %vm1321_vm9 = vcmp.eq.f32.partialorder %v3052_v9, %v3396_v62 }
 0x1d4   :  { %v3392_v19 = vpop.xlane.xlu2 %1335  ;;  %v1322_v49 = vsel %vm1321_vm9, %v1317_v34, inf  ;;  %v1141_v34 = vcvt.s32.f32 %v1139_v0 }
 0x1d5   :  { %vm1337_vm2 = vcmp.eq.f32.partialorder %v3048_v1, %v3392_v19  ;;  %1323 = vmin.xlane.f32.xlu2 %v1322_v49  ;;  %v1093_v1 = vcvt.s32.f32 %v1091_v26  ;;  %v1155_v49 = vand.u32 65535, %v3241_v20 }
 0x1d6   :  { %v1338_v16 = vsel %vm1337_vm2, %v1333_v53, inf }
 0x1d7   :  { %1339 = vmin.xlane.f32.xlu0 %v1338_v16  ;;  %v1157_v25 = vcvt.s32.f32 %v1155_v49  ;;  %v1214_v49 = vcvt.f32.s32 %v3314_v59 }
 0x1d8   :  { %v3408_v35 = vpop.xlane.xlu0 %1351 }
 0x1d9   :  { %vm1353_vm8 = vcmp.eq.f32.partialorder %v3095_v51, %v3408_v35  ;;  %v1363_v51 = vand.u32 65535, %v3951_v55 }
 0x1da   :  { %v1354_v30 = vsel %vm1353_vm8, %v1349_v24, inf }
 0x1db   :  { %1355 = vmin.xlane.f32.xlu1 %v1354_v30  ;;  %v1365_v22 = vcvt.s32.f32 %v1363_v51  ;;  %v1427_v30 = vand.u32 65535, %v3289_v10 }
 0x1dc   :  { %v3406_v47 = vpop.xlane.xlu2 %1095  ;;  %v3415_v4 = vpop.xlane.xlu1 %1111 }
 0x1dd   :  { %vm1097_vm11 = vcmp.eq.f32.partialorder %v3093_v63, %v3406_v47  ;;  %vm1113_vm4 = vcmp.eq.f32.partialorder %v3950_v45, %v3415_v4  ;;  %v1123_v63 = vand.u32 65535, %v3162_v48  ;;  %v3954_v48 = vld [vmem:[#allocation75_spill] sm:$0xff]  ;;  %v1429_v45 = vcvt.s32.f32 %v1427_v30 }
 0x1de   :  { %v1098_v9 = vsel %vm1097_vm11, %v1093_v1, inf  ;;  %v1114_v46 = vsel %vm1113_vm4, %v1109_v57, inf  ;;  %v3955_v1 = vld [vmem:[#allocation15_spill] sm:$0xff] }
 0x1df   :  { %1099 = vmin.xlane.f32.xlu0 %v1098_v9  ;;  %1115 = vmin.xlane.f32.xlu2 %v1114_v46  ;;  %v1125_v27 = vcvt.s32.f32 %v1123_v63  ;;  %v942_v9 = vcvt.f32.s32 %v3269_v41 }
 0x1e1   :  { %v943_v37 = vshll.u32 %v942_v9, 16  ;;  %v1198_v9 = vcvt.f32.s32 %v3320_v12  ;;  %v958_v12 = vcvt.f32.s32 %v3326_v17 }
 0x1e3   :  { %v3424_v23 = vpop.xlane.xlu0 %1127 }
 0x1e4   :  { %v3422_v3 = vpop.xlane.xlu2 %1383  ;;  %v3426_v5 = vpop.xlane.xlu1 %1367  ;;  %vm1129_vm0 = vcmp.eq.f32.partialorder %v3953_v39, %v3424_v23 }
 0x1e5   :  { %vm1385_vm13 = vcmp.eq.f32.partialorder %v3952_v28, %v3422_v3  ;;  %v1130_v6 = vsel %vm1129_vm0, %v1125_v27, inf  ;;  %vm1369_vm2 = vcmp.eq.f32.partialorder %v3954_v48, %v3426_v5  ;;  %v974_v28 = vcvt.f32.s32 %v3307_v15 }
 0x1e6   :  { %v1386_v61 = vsel %vm1385_vm13, %v1381_v42, inf  ;;  %1131 = vmin.xlane.f32.xlu1 %v1130_v6  ;;  %v1370_v53 = vsel %vm1369_vm2, %v1365_v22, inf }
 0x1e7   :  { %1387 = vmin.xlane.f32.xlu0 %v1386_v61  ;;  %1371 = vmin.xlane.f32.xlu2 %v1370_v53 }
 0x1eb   :  { %v3444_v24 = vpop.xlane.xlu0 %1399 }
 0x1ec   :  { %v3435_v16 = vpop.xlane.xlu2 %1143 }
 0x1ed   :  { %vm1145_vm5 = vcmp.eq.f32.partialorder %v3217_v21, %v3435_v16  ;;  %v1171_v21 = vand.u32 65535, %v3294_v52  ;;  %v1411_v52 = vand.u32 65535, %v3299_v8  ;;  %v975_v8 = vshll.u32 %v974_v28, 16 }
 0x1ee   :  { %v1146_v2 = vsel %vm1145_vm5, %v1141_v34, inf  ;;  %v1541_v34 = vld [vmem:[#allocation3 + $0x10] sm:$0xff] }
 0x1ef   :  { %1147 = vmin.xlane.f32.xlu0 %v1146_v2  ;;  %v1173_v63 = vcvt.s32.f32 %v1171_v21  ;;  %v1413_v22 = vcvt.s32.f32 %v1411_v52  ;;  %v1215_v21 = vshll.u32 %v1214_v49, 16 }
 0x1f0   :  { %v3440_v26 = vpop.xlane.xlu1 %1159 }
 0x1f1   :  { %vm1161_vm9 = vcmp.eq.f32.partialorder %v3955_v1, %v3440_v26 }
 0x1f2   :  { %v1162_v54 = vsel %vm1161_vm9, %v1157_v25, inf }
 0x1f3   :  { %1163 = vmin.xlane.f32.xlu2 %v1162_v54  ;;  %v1542_v54 = vld [vmem:[#allocation3 + $0x18] sm:$0xff] }
 0x1f8   :  { %v940_v56 = vpop.xlane.xlu1 %939 }
 0x1f9   :  { %v941_v20 = vcvt.f32.s32 %v940_v56 }
 0x1fb   :  { %v3449_v57 = vpop.xlane.xlu2 %1431  ;;  %v944_v55 = vadd.s32 %v943_v37, %v941_v20  ;;  %v1556_v37 = vld [vmem:[#allocation3 + $0x88] sm:$0xff] }
 0x1fc   :  { %v3451_v46 = vpop.xlane.xlu0 %1175  ;;  %vm1433_vm11 = vcmp.eq.f32.partialorder %v3297_v18, %v3449_v57  ;;  %v3958_v18 = vld [vmem:[#allocation10_spill] sm:$0xff] }
 0x1fd   :  { %v1434_v51 = vsel %vm1433_vm11, %v1429_v45, inf  ;;  %vm1177_vm8 = vcmp.eq.f32.partialorder %v3301_v29, %v3451_v46  ;;  %v1571_v27 = vsel %vm1507_vm1, %v944_v55, %v1539_v32  ;;  %v1395_v39 = vand.u32 65535, %v3958_v18  ;;  %v3959_v29 = vld [vmem:[#allocation76_spill] sm:$0xff] }
 0x1fe   :  { %1435 = vmin.xlane.f32.xlu0 %v1434_v51  ;;  %v1178_v10 = vsel %vm1177_vm8, %v1173_v63, inf  ;;  %1604 = vst.msk [vmem:[#allocation3] sm:$0xff] %vm21_vm12, %v1571_v27  ;;  %vm1401_vm4 = vcmp.eq.f32.partialorder %v3959_v29, %v3444_v24  ;;  %v1199_v45 = vshll.u32 %v1198_v9, 16  ;;  %v990_v18 = vcvt.f32.s32 %v3331_v50  ;;  %v1558_v27 = vld [vmem:[#allocation3 + $0x98] sm:$0xff] }
 0x1ff   :  { %1179 = vmin.xlane.f32.xlu1 %v1178_v10  ;;  %v1397_v53 = vcvt.s32.f32 %v1395_v39  ;;  %v1555_v10 = vld [vmem:[#allocation3 + $0x80] sm:$0xff]  ;;  %v1278_v50 = vcvt.f32.s32 %v3361_v31 }
 0x200   :  { %v3464_v61 = vpop.xlane.xlu1 %1415 }
 0x201   :  { %vm1417_vm13 = vcmp.eq.f32.partialorder %v3309_v58, %v3464_v61  ;;  %v1402_v2 = vsel %vm1401_vm4, %v1397_v53, inf }
 0x202   :  { %v1418_v0 = vsel %vm1417_vm13, %v1413_v22, inf  ;;  %v959_v22 = vshll.u32 %v958_v12, 16 }
 0x203   :  { %v972_v6 = vpop.xlane.xlu2 %971  ;;  %1419 = vmin.xlane.f32.xlu2 %v1418_v0  ;;  %v991_v0 = vshll.u32 %v990_v18, 16 }
 0x204   :  { %v973_v48 = vcvt.f32.s32 %v972_v6  ;;  %v1230_v6 = vcvt.f32.s32 %v3333_v14 }
 0x205   :  { %v1735_v25 = vld [vmem:[#allocation3] sm:$0xff] }
 0x206   :  { %v976_v15 = vadd.s32 %v975_v8, %v973_v48  ;;  %1767 = vst.msk [vmem:[%s3756_s4] sm:$0xff] %vm21_vm12, %v1735_v25  ;;  %v1540_v48 = vld [vmem:[#allocation3 + $0x8] sm:$0xff] }
 0x207   :  { %1403 = vmin.xlane.f32.xlu1 %v1402_v2  ;;  %v1231_v2 = vshll.u32 %v1230_v6, 16  ;;  %v1544_v6 = vld [vmem:[#allocation3 + $0x28] sm:$0xff] }
 0x208   :  { %v1573_v58 = vsel %vm1509_vm14, %v976_v15, %v1541_v34  ;;  %v1212_v30 = vpop.xlane.xlu1 %1211 }
 0x209   :  { %1606 = vst.msk [vmem:[#allocation3 + $0x10] sm:$0xff] %vm21_vm12, %v1573_v58  ;;  %v1213_v56 = vcvt.f32.s32 %v1212_v30  ;;  %v1557_v58 = vld [vmem:[#allocation3 + $0x90] sm:$0xff] }
 0x20b   :  { %v1216_v59 = vadd.s32 %v1215_v21, %v1213_v56  ;;  %v1246_v21 = vcvt.f32.s32 %v3342_v13  ;;  %v1262_v56 = vcvt.f32.s32 %v3344_v36 }
 0x20d   :  { %v1588_v51 = vsel %vm1524_vm10, %v1216_v59, %v1556_v37  ;;  %v1263_v13 = vshll.u32 %v1262_v56, 16  ;;  %v1279_v56 = vshll.u32 %v1278_v50, 16  ;;  %v1543_v37 = vld [vmem:[#allocation3 + $0x20] sm:$0xff] }
 0x20e   :  { %v1196_v20 = vpop.xlane.xlu0 %1195  ;;  %1621 = vst.msk [vmem:[#allocation3 + $0x88] sm:$0xff] %vm21_vm12, %v1588_v51  ;;  %v3991_v50 = vld [vmem:[#allocation44_spill] sm:$0xff] }
 0x20f   :  { %v1197_v32 = vcvt.f32.s32 %v1196_v20 }
 0x210   :  { %v1737_v52 = vld [vmem:[#allocation3 + $0x10] sm:$0xff] }
 0x211   :  { %v1200_v41 = vadd.s32 %v1199_v45, %v1197_v32  ;;  %1769 = vst.msk [vmem:[%s3756_s4 + $0x10] sm:$0xff] %vm21_vm12, %v1737_v52  ;;  %v1022_v45 = vcvt.f32.s32 %v3346_v38  ;;  %v1247_v52 = vshll.u32 %v1246_v21, 16  ;;  %v1560_v32 = vld [vmem:[#allocation3 + $0xa8] sm:$0xff] }
 0x213   :  { %v1587_v28 = vsel %vm1523_vm6, %v1200_v41, %v1555_v10  ;;  %v1023_v42 = vshll.u32 %v1022_v45, 16 }
 0x214   :  { %1620 = vst.msk [vmem:[#allocation3 + $0x80] sm:$0xff] %vm21_vm12, %v1587_v28  ;;  %v1559_v28 = vld [vmem:[#allocation3 + $0xa0] sm:$0xff] }
 0x215   :  { %v1752_v8 = vld [vmem:[#allocation3 + $0x88] sm:$0xff] }
 0x216   :  { %v956_v39 = vpop.xlane.xlu0 %955  ;;  %1784 = vst.msk [vmem:[%s3756_s4 + $0x88] sm:$0xff] %vm21_vm12, %v1752_v8  ;;  %v1006_v8 = vcvt.f32.s32 %v3357_v43  ;;  %v3978_v43 = vld [vmem:[#allocation39_spill] sm:$0xff] }
 0x217   :  { %v957_v29 = vcvt.f32.s32 %v956_v39 }
 0x218   :  { %v1007_v31 = vshll.u32 %v1006_v8, 16 }
 0x219   :  { %v960_v17 = vadd.s32 %v959_v22, %v957_v29 }
 0x21b   :  { %v1751_v49 = vld [vmem:[#allocation3 + $0x80] sm:$0xff]  ;;  %v1572_v1 = vsel %vm1508_vm7, %v960_v17, %v1540_v48  ;;  %v1038_v48 = vcvt.f32.s32 %v3359_v44 }
 0x21c   :  { %1783 = vst.msk [vmem:[%s3756_s4 + $0x80] sm:$0xff] %vm21_vm12, %v1751_v49 }
 0x21d   :  { %1605 = vst.msk [vmem:[#allocation3 + $0x8] sm:$0xff] %vm21_vm12, %v1572_v1  ;;  %v3979_v1 = vld [vmem:[#allocation37_spill] sm:$0xff] }
 0x21e   :  { %v1228_v34 = vpop.xlane.xlu2 %1227  ;;  %vm3980_vm10 = vcmp.lt.f32.partialorder %v3978_v43, %v3979_v1  ;;  %v1070_v43 = vcvt.f32.s32 %v3383_v60 }
 0x21f   :  { %v1229_v14 = vcvt.f32.s32 %v1228_v34 }
 0x221   :  { %v988_v53 = vpop.xlane.xlu1 %987  ;;  %v1232_v30 = vadd.s32 %v1231_v2, %v1229_v14  ;;  %v3976_v2 = vld [vmem:[#allocation32_spill] sm:$0xff] }
 0x222   :  { %v989_v15 = vcvt.f32.s32 %v988_v53  ;;  %v3972_v53 = vld [vmem:[#allocation35_spill] sm:$0xff] }
 0x223   :  { %v1589_v55 = vsel %vm1525_vm15, %v1232_v30, %v1557_v58  ;;  %v1039_v58 = vshll.u32 %v1038_v48, 16  ;;  %v1561_v48 = vld [vmem:[#allocation3 + $0xb0] sm:$0xff] }
 0x224   :  { %v992_v9 = vadd.s32 %v991_v0, %v989_v15  ;;  %1622 = vst.msk [vmem:[#allocation3 + $0x90] sm:$0xff] %vm21_vm12, %v1589_v55  ;;  %v1736_v38 = vld [vmem:[#allocation3 + $0x8] sm:$0xff]  ;;  %v3973_v0 = vld [vmem:[#allocation34_spill] sm:$0xff] }
 0x225   :  { %1768 = vst.msk [vmem:[%s3756_s4 + $0x8] sm:$0xff] %vm21_vm12, %v1736_v38  ;;  %vm3974_vm1 = vcmp.lt.f32.partialorder %v3972_v53, %v3973_v0  ;;  %v3975_v15 = vld [vmem:[#allocation33_spill] sm:$0xff]  ;;  %v1562_v0 = vld [vmem:[#allocation3 + $0xb8] sm:$0xff] }
 0x226   :  { %v1574_v20 = vsel %vm1510_vm3, %v992_v9, %v1542_v54  ;;  %vm3977_vm7 = vcmp.lt.f32.partialorder %v3975_v15, %v3976_v2  ;;  %v1054_v15 = vcvt.f32.s32 %v3381_v11 }
 0x227   :  { %1607 = vst.msk [vmem:[#allocation3 + $0x18] sm:$0xff] %vm21_vm12, %v1574_v20  ;;  %v1545_v20 = vld [vmem:[#allocation3 + $0x30] sm:$0xff] }
 0x228   :  { %v1020_v12 = vpop.xlane.xlu2 %1019 }
 0x229   :  { %v1260_v10 = vpop.xlane.xlu1 %1259  ;;  %v1021_v18 = vcvt.f32.s32 %v1020_v12 }
 0x22a   :  { %v1244_v51 = vpop.xlane.xlu0 %1243  ;;  %v1261_v36 = vcvt.f32.s32 %v1260_v10  ;;  %v3981_v10 = vld [vmem:[#allocation41_spill] sm:$0xff] }
 0x22b   :  { %v1245_v41 = vcvt.f32.s32 %v1244_v51  ;;  %v1024_v29 = vadd.s32 %v1023_v42, %v1021_v18  ;;  %v1753_v25 = vld [vmem:[#allocation3 + $0x90] sm:$0xff]  ;;  %v1294_v51 = vcvt.f32.s32 %v3371_v33  ;;  %v1310_v42 = vcvt.f32.s32 %v3373_v7 }
 0x22c   :  { %v1264_v22 = vadd.s32 %v1263_v13, %v1261_v36  ;;  %1785 = vst.msk [vmem:[%s3756_s4 + $0x90] sm:$0xff] %vm21_vm12, %v1753_v25  ;;  %v3985_v36 = vld [vmem:[#allocation42_spill] sm:$0xff] }
 0x22d   :  { %v1248_v39 = vadd.s32 %v1247_v52, %v1245_v41  ;;  %v1576_v44 = vsel %vm3980_vm10, %v1024_v29, %v1544_v6  ;;  %v3982_v52 = vld [vmem:[#allocation40_spill] sm:$0xff]  ;;  %v3984_v41 = vld [vmem:[#allocation43_spill] sm:$0xff]  ;;  %v1311_v8 = vshll.u32 %v1310_v42, 16 }
 0x22e   :  { %v1738_v17 = vld [vmem:[#allocation3 + $0x18] sm:$0xff]  ;;  %v1591_v49 = vsel %vm3977_vm7, %v1264_v22, %v1559_v28  ;;  %1609 = vst.msk [vmem:[#allocation3 + $0x28] sm:$0xff] %vm21_vm12, %v1576_v44  ;;  %vm3983_vm14 = vcmp.lt.f32.partialorder %v3981_v10, %v3982_v52  ;;  %vm3986_vm6 = vcmp.lt.f32.partialorder %v3984_v41, %v3985_v36  ;;  %v3988_v28 = vld [vmem:[#allocation36_spill] sm:$0xff]  ;;  %v1295_v22 = vshll.u32 %v1294_v51, 16  ;;  %v3999_v10 = vld [vmem:[#allocation53_spill] sm:$0xff] }
 0x22f   :  { %v1590_v34 = vsel %vm3974_vm1, %v1248_v39, %v1558_v27  ;;  %1770 = vst.msk [vmem:[%s3756_s4 + $0x18] sm:$0xff] %vm21_vm12, %v1738_v17  ;;  %v3987_v27 = vld [vmem:[#allocation38_spill] sm:$0xff]  ;;  %v3993_v44 = vld [vmem:[#allocation47_spill] sm:$0xff]  ;;  %v1086_v51 = vcvt.f32.s32 %v3394_v40  ;;  %v1326_v41 = vcvt.f32.s32 %v3396_v62  ;;  %v1564_v62 = vld [vmem:[#allocation3 + $0xc8] sm:$0xff] }
 0x230   :  { %1623 = vst.msk [vmem:[#allocation3 + $0x98] sm:$0xff] %vm21_vm12, %v1590_v34  ;;  %v1276_v30 = vpop.xlane.xlu2 %1275  ;;  %vm3989_vm15 = vcmp.lt.f32.partialorder %v3987_v27, %v3988_v28  ;;  %v4000_v52 = vld [vmem:[#allocation51_spill] sm:$0xff] }
 0x231   :  { %v1036_v54 = vpop.xlane.xlu1 %1035  ;;  %1624 = vst.msk [vmem:[#allocation3 + $0xa0] sm:$0xff] %vm21_vm12, %v1591_v49  ;;  %v1277_v59 = vcvt.f32.s32 %v1276_v30  ;;  %v3990_v49 = vld [vmem:[#allocation45_spill] sm:$0xff]  ;;  %vm4001_vm5 = vcmp.lt.f32.partialorder %v3999_v10, %v4000_v52  ;;  %v1087_v28 = vshll.u32 %v1086_v51, 16 }
 0x232   :  { %v1004_v14 = vpop.xlane.xlu0 %1003  ;;  %v1037_v21 = vcvt.f32.s32 %v1036_v54  ;;  %vm3992_vm3 = vcmp.lt.f32.partialorder %v3990_v49, %v3991_v50  ;;  %v4005_v49 = vld [vmem:[#allocation57_spill] sm:$0xff]  ;;  %v4006_v50 = vld [vmem:[#allocation55_spill] sm:$0xff] }
 0x233   :  { %v1005_v9 = vcvt.f32.s32 %v1004_v14  ;;  %v1280_v55 = vadd.s32 %v1279_v56, %v1277_v59  ;;  %v3994_v14 = vld [vmem:[#allocation46_spill] sm:$0xff]  ;;  %v1547_v59 = vld [vmem:[#allocation3 + $0x40] sm:$0xff]  ;;  %vm4007_vm11 = vcmp.lt.f32.partialorder %v4005_v49, %v4006_v50 }
 0x234   :  { %v1040_v63 = vadd.s32 %v1039_v58, %v1037_v21  ;;  %vm3995_vm0 = vcmp.lt.f32.partialorder %v3993_v44, %v3994_v14  ;;  %v1546_v21 = vld [vmem:[#allocation3 + $0x38] sm:$0xff]  ;;  %v4023_v49 = vld [vmem:[#allocation70_spill] sm:$0xff]  ;;  %v4024_v50 = vld [vmem:[#allocation68_spill] sm:$0xff] }
 0x235   :  { %v1008_v45 = vadd.s32 %v1007_v31, %v1005_v9  ;;  %v1592_v18 = vsel %vm3989_vm15, %v1280_v55, %v1560_v32  ;;  %v1740_v7 = vld [vmem:[#allocation3 + $0x28] sm:$0xff]  ;;  %v1055_v31 = vshll.u32 %v1054_v15, 16  ;;  %v1071_v9 = vshll.u32 %v1070_v43, 16  ;;  %v4009_v43 = vld [vmem:[#allocation50_spill] sm:$0xff] }
 0x236   :  { %v1577_v12 = vsel %vm3986_vm6, %v1040_v63, %v1545_v20  ;;  %1625 = vst.msk [vmem:[#allocation3 + $0xa8] sm:$0xff] %vm21_vm12, %v1592_v18  ;;  %v3996_v32 = vld [vmem:[#allocation49_spill] sm:$0xff]  ;;  %v3997_v63 = vld [vmem:[#allocation48_spill] sm:$0xff]  ;;  %v1358_v15 = vcvt.f32.s32 %v3408_v35  ;;  %vm4025_vm10 = vcmp.lt.f32.partialorder %v4023_v49, %v4024_v50  ;;  %v4045_v50 = vld [vmem:[#allocation6_spill] sm:$0xff] }
 0x237   :  { %v1575_v13 = vsel %vm3983_vm14, %v1008_v45, %v1543_v37  ;;  %v1754_v38 = vld [vmem:[#allocation3 + $0x98] sm:$0xff]  ;;  %1772 = vst.msk [vmem:[%s3756_s4 + $0x28] sm:$0xff] %vm21_vm12, %v1740_v7  ;;  %v1342_v45 = vcvt.f32.s32 %v3392_v19  ;;  %vm3998_vm2 = vcmp.lt.f32.partialorder %v3996_v32, %v3997_v63  ;;  %v1548_v7 = vld [vmem:[#allocation3 + $0x48] sm:$0xff]  ;;  %v4044_v49 = vld [vmem:[#allocation4_spill] sm:$0xff] }
 0x238   :  { %1608 = vst.msk [vmem:[#allocation3 + $0x20] sm:$0xff] %vm21_vm12, %v1575_v13  ;;  %v1755_v33 = vld [vmem:[#allocation3 + $0xa0] sm:$0xff] }
 0x239   :  { %1786 = vst.msk [vmem:[%s3756_s4 + $0x98] sm:$0xff] %vm21_vm12, %v1754_v38  ;;  %v1308_v29 = vpop.xlane.xlu1 %1307  ;;  %v1343_v42 = vshll.u32 %v1342_v45, 16  ;;  %v4015_v45 = vld [vmem:[#allocation58_spill] sm:$0xff] }
 0x23a   :  { %v1292_v39 = vpop.xlane.xlu0 %1291  ;;  %1787 = vst.msk [vmem:[%s3756_s4 + $0xa0] sm:$0xff] %vm21_vm12, %v1755_v33  ;;  %v1309_v17 = vcvt.f32.s32 %v1308_v29  ;;  %v1327_v33 = vshll.u32 %v1326_v41, 16 }
 0x23b   :  { %v1293_v6 = vcvt.f32.s32 %v1292_v39  ;;  %1610 = vst.msk [vmem:[#allocation3 + $0x30] sm:$0xff] %vm21_vm12, %v1577_v12 }
 0x23c   :  { %v1312_v34 = vadd.s32 %v1311_v8, %v1309_v17  ;;  %v1102_v8 = vcvt.f32.s32 %v3406_v47  ;;  %v4002_v17 = vld [vmem:[#allocation56_spill] sm:$0xff] }
 0x23d   :  { %v1296_v53 = vadd.s32 %v1295_v22, %v1293_v6  ;;  %v1756_v1 = vld [vmem:[#allocation3 + $0xa8] sm:$0xff]  ;;  %v1563_v6 = vld [vmem:[#allocation3 + $0xc0] sm:$0xff] }
 0x23e   :  { %v1594_v54 = vsel %vm3995_vm0, %v1312_v34, %v1562_v0  ;;  %1788 = vst.msk [vmem:[%s3756_s4 + $0xa8] sm:$0xff] %vm21_vm12, %v1756_v1  ;;  %v4008_v47 = vld [vmem:[#allocation52_spill] sm:$0xff]  ;;  %v1103_v44 = vshll.u32 %v1102_v8, 16 }
 0x23f   :  { %v1739_v2 = vld [vmem:[#allocation3 + $0x20] sm:$0xff]  ;;  %v1593_v25 = vsel %vm3992_vm3, %v1296_v53, %v1561_v48  ;;  %1627 = vst.msk [vmem:[#allocation3 + $0xb8] sm:$0xff] %vm21_vm12, %v1594_v54  ;;  %v4003_v53 = vld [vmem:[#allocation54_spill] sm:$0xff]  ;;  %vm4010_vm8 = vcmp.lt.f32.partialorder %v4008_v47, %v4009_v43 }
 0x240   :  { %1771 = vst.msk [vmem:[%s3756_s4 + $0x20] sm:$0xff] %vm21_vm12, %v1739_v2  ;;  %v1068_v58 = vpop.xlane.xlu2 %1067  ;;  %vm4004_vm9 = vcmp.lt.f32.partialorder %v4002_v17, %v4003_v53  ;;  %v1150_v53 = vcvt.f32.s32 %v3435_v16  ;;  %v4026_v43 = vld [vmem:[#allocation64_spill] sm:$0xff] }
 0x241   :  { %1626 = vst.msk [vmem:[#allocation3 + $0xb0] sm:$0xff] %vm21_vm12, %v1593_v25  ;;  %v1069_v56 = vcvt.f32.s32 %v1068_v58 }
 0x242   :  { %v1052_v11 = vpop.xlane.xlu0 %1051  ;;  %v1741_v30 = vld [vmem:[#allocation3 + $0x30] sm:$0xff] }
 0x243   :  { %v1053_v60 = vcvt.f32.s32 %v1052_v11  ;;  %1773 = vst.msk [vmem:[%s3756_s4 + $0x30] sm:$0xff] %vm21_vm12, %v1741_v30  ;;  %v1072_v20 = vadd.s32 %v1071_v9, %v1069_v56  ;;  %v1359_v11 = vshll.u32 %v1358_v15, 16  ;;  %v1565_v9 = vld [vmem:[#allocation3 + $0xd0] sm:$0xff]  ;;  %v4011_v56 = vld [vmem:[#allocation61_spill] sm:$0xff] }
 0x245   :  { %v1056_v37 = vadd.s32 %v1055_v31, %v1053_v60  ;;  %v1579_v13 = vsel %vm4001_vm5, %v1072_v20, %v1547_v59  ;;  %v1084_v27 = vpop.xlane.xlu1 %1083  ;;  %v1549_v31 = vld [vmem:[#allocation3 + $0x50] sm:$0xff]  ;;  %v4014_v20 = vld [vmem:[#allocation60_spill] sm:$0xff]  ;;  %vm4046_vm5 = vcmp.lt.f32.partialorder %v4044_v49, %v4045_v50 }
 0x246   :  { %1612 = vst.msk [vmem:[#allocation3 + $0x40] sm:$0xff] %vm21_vm12, %v1579_v13  ;;  %v1758_v19 = vld [vmem:[#allocation3 + $0xb8] sm:$0xff]  ;;  %v1085_v38 = vcvt.f32.s32 %v1084_v27  ;;  %vm4016_vm13 = vcmp.lt.f32.partialorder %v4014_v20, %v4015_v45  ;;  %v1134_v27 = vcvt.f32.s32 %v3424_v23  ;;  %v1553_v20 = vld [vmem:[#allocation3 + $0x70] sm:$0xff] }
 0x247   :  { %v1578_v55 = vsel %vm3998_vm2, %v1056_v37, %v1546_v21  ;;  %1790 = vst.msk [vmem:[%s3756_s4 + $0xb8] sm:$0xff] %vm21_vm12, %v1758_v19  ;;  %v1118_v21 = vcvt.f32.s32 %v3415_v4  ;;  %v4012_v37 = vld [vmem:[#allocation59_spill] sm:$0xff] }
 0x248   :  { %1611 = vst.msk [vmem:[#allocation3 + $0x38] sm:$0xff] %vm21_vm12, %v1578_v55  ;;  %v1757_v36 = vld [vmem:[#allocation3 + $0xb0] sm:$0xff]  ;;  %v1324_v18 = vpop.xlane.xlu2 %1323  ;;  %v1088_v29 = vadd.s32 %v1087_v28, %v1085_v38  ;;  %vm4013_vm4 = vcmp.lt.f32.partialorder %v4011_v56, %v4012_v37  ;;  %v1550_v13 = vld [vmem:[#allocation3 + $0x58] sm:$0xff]  ;;  %v1135_v23 = vshll.u32 %v1134_v27, 16 }
 0x249   :  { %1789 = vst.msk [vmem:[%s3756_s4 + $0xb0] sm:$0xff] %vm21_vm12, %v1757_v36  ;;  %v1325_v22 = vcvt.f32.s32 %v1324_v18  ;;  %v1119_v51 = vshll.u32 %v1118_v21, 16  ;;  %v1390_v36 = vcvt.f32.s32 %v3422_v3  ;;  %v1554_v27 = vld [vmem:[#allocation3 + $0x78] sm:$0xff] }
 0x24a   :  { %v1340_v12 = vpop.xlane.xlu0 %1339  ;;  %v1580_v25 = vsel %vm4007_vm11, %v1088_v29, %v1548_v7 }
 0x24b   :  { %v1341_v40 = vcvt.f32.s32 %v1340_v12  ;;  %v1328_v34 = vadd.s32 %v1327_v33, %v1325_v22  ;;  %1613 = vst.msk [vmem:[#allocation3 + $0x48] sm:$0xff] %vm21_vm12, %v1580_v25  ;;  %v4017_v12 = vld [vmem:[#allocation65_spill] sm:$0xff]  ;;  %v1391_v18 = vshll.u32 %v1390_v36, 16 }
 0x24d   :  { %v1344_v39 = vadd.s32 %v1343_v42, %v1341_v40  ;;  %v1743_v2 = vld [vmem:[#allocation3 + $0x40] sm:$0xff]  ;;  %v1595_v1 = vsel %vm4010_vm8, %v1328_v34, %v1563_v6  ;;  %v4018_v42 = vld [vmem:[#allocation63_spill] sm:$0xff] }
 0x24e   :  { %1775 = vst.msk [vmem:[%s3756_s4 + $0x40] sm:$0xff] %vm21_vm12, %v1743_v2  ;;  %v1356_v54 = vpop.xlane.xlu1 %1355  ;;  %vm4019_vm1 = vcmp.lt.f32.partialorder %v4017_v12, %v4018_v42  ;;  %v4021_v34 = vld [vmem:[#allocation67_spill] sm:$0xff] }
 0x24f   :  { %v1742_v48 = vld [vmem:[#allocation3 + $0x38] sm:$0xff]  ;;  %v1596_v0 = vsel %vm4004_vm9, %v1344_v39, %v1564_v62  ;;  %1628 = vst.msk [vmem:[#allocation3 + $0xc0] sm:$0xff] %vm21_vm12, %v1595_v1  ;;  %v1357_v60 = vcvt.f32.s32 %v1356_v54  ;;  %v1374_v62 = vcvt.f32.s32 %v3426_v5  ;;  %v1567_v39 = vld [vmem:[#allocation3 + $0xe0] sm:$0xff]  ;;  %v4027_v1 = vld [vmem:[#allocation62_spill] sm:$0xff] }
 0x250   :  { %1774 = vst.msk [vmem:[%s3756_s4 + $0x38] sm:$0xff] %vm21_vm12, %v1742_v48  ;;  %v1551_v48 = vld [vmem:[#allocation3 + $0x60] sm:$0xff]  ;;  %v1566_v5 = vld [vmem:[#allocation3 + $0xd8] sm:$0xff]  ;;  %vm4028_vm14 = vcmp.lt.f32.partialorder %v4026_v43, %v4027_v1  ;;  %v1552_v54 = vld [vmem:[#allocation3 + $0x68] sm:$0xff] }
 0x251   :  { %1629 = vst.msk [vmem:[#allocation3 + $0xc8] sm:$0xff] %vm21_vm12, %v1596_v0  ;;  %v1360_v30 = vadd.s32 %v1359_v11, %v1357_v60  ;;  %v1375_v6 = vshll.u32 %v1374_v62, 16  ;;  %v4020_v0 = vld [vmem:[#allocation69_spill] sm:$0xff]  ;;  %v1570_v12 = vld [vmem:[#allocation3 + $0xf8] sm:$0xff] }
 0x252   :  { %v1100_v35 = vpop.xlane.xlu0 %1099  ;;  %v1116_v4 = vpop.xlane.xlu2 %1115  ;;  %v1744_v10 = vld [vmem:[#allocation3 + $0x48] sm:$0xff]  ;;  %vm4022_vm7 = vcmp.lt.f32.partialorder %v4020_v0, %v4021_v34  ;;  %v4042_v0 = vld [vmem:[#allocation8_spill] sm:$0xff] }
 0x253   :  { %v1101_v14 = vcvt.f32.s32 %v1100_v35  ;;  %v1597_v32 = vsel %vm4016_vm13, %v1360_v30, %v1565_v9  ;;  %v1117_v52 = vcvt.f32.s32 %v1116_v4  ;;  %1776 = vst.msk [vmem:[%s3756_s4 + $0x48] sm:$0xff] %vm21_vm12, %v1744_v10  ;;  %v4030_v9 = vld [vmem:[#allocation7_spill] sm:$0xff]  ;;  %v1438_v4 = vcvt.f32.s32 %v3449_v57 }
 0x254   :  { %1630 = vst.msk [vmem:[#allocation3 + $0xd0] sm:$0xff] %vm21_vm12, %v1597_v32  ;;  %v4032_v32 = vld [vmem:[#allocation9_spill] sm:$0xff]  ;;  %v1422_v57 = vcvt.f32.s32 %v3464_v61 }
 0x255   :  { %v1104_v58 = vadd.s32 %v1103_v44, %v1101_v14  ;;  %v1120_v41 = vadd.s32 %v1119_v51, %v1117_v52  ;;  %v1151_v44 = vshll.u32 %v1150_v53, 16  ;;  %v1182_v51 = vcvt.f32.s32 %v3451_v46  ;;  %v4035_v46 = vld [vmem:[#allocation78_spill] sm:$0xff]  ;;  %v4041_v53 = vld [vmem:[#allocation77_spill] sm:$0xff] }
 0x256   :  { %v1759_v55 = vld [vmem:[#allocation3 + $0xc0] sm:$0xff]  ;;  %vm4043_vm2 = vcmp.lt.f32.partialorder %v4041_v53, %v4042_v0 }
 0x257   :  { %v1581_v59 = vsel %vm4013_vm4, %v1104_v58, %v1549_v31  ;;  %1791 = vst.msk [vmem:[%s3756_s4 + $0xc0] sm:$0xff] %vm21_vm12, %v1759_v55  ;;  %v1582_v40 = vsel %vm4019_vm1, %v1120_v41, %v1550_v13  ;;  %v1166_v31 = vcvt.f32.s32 %v3440_v26  ;;  %v4029_v58 = vld [vmem:[#allocation5_spill] sm:$0xff]  ;;  %v1439_v13 = vshll.u32 %v1438_v4, 16 }
 0x258   :  { %1614 = vst.msk [vmem:[#allocation3 + $0x50] sm:$0xff] %vm21_vm12, %v1581_v59  ;;  %v1760_v63 = vld [vmem:[#allocation3 + $0xc8] sm:$0xff]  ;;  %vm4031_vm6 = vcmp.lt.f32.partialorder %v4029_v58, %v4030_v9 }
 0x259   :  { %1792 = vst.msk [vmem:[%s3756_s4 + $0xc8] sm:$0xff] %vm21_vm12, %v1760_v63  ;;  %v1132_v33 = vpop.xlane.xlu1 %1131  ;;  %v1167_v37 = vshll.u32 %v1166_v31, 16  ;;  %v4033_v63 = vld [vmem:[#allocation11_spill] sm:$0xff] }
 0x25a   :  { %1615 = vst.msk [vmem:[#allocation3 + $0x58] sm:$0xff] %vm21_vm12, %v1582_v40  ;;  %v1388_v3 = vpop.xlane.xlu0 %1387  ;;  %v1372_v22 = vpop.xlane.xlu2 %1371  ;;  %v1133_v7 = vcvt.f32.s32 %v1132_v33  ;;  %vm4034_vm15 = vcmp.lt.f32.partialorder %v4032_v32, %v4033_v63  ;;  %v4038_v33 = vld [vmem:[#allocation79_spill] sm:$0xff] }
 0x25b   :  { %v1761_v28 = vld [vmem:[#allocation3 + $0xd0] sm:$0xff]  ;;  %v1389_v38 = vcvt.f32.s32 %v1388_v3  ;;  %v1373_v8 = vcvt.f32.s32 %v1372_v22  ;;  %v4036_v3 = vld [vmem:[#allocation12_spill] sm:$0xff]  ;;  %v1423_v22 = vshll.u32 %v1422_v57, 16 }
 0x25c   :  { %1793 = vst.msk [vmem:[%s3756_s4 + $0xd0] sm:$0xff] %vm21_vm12, %v1761_v28  ;;  %v1136_v17 = vadd.s32 %v1135_v23, %v1133_v7  ;;  %vm4037_vm3 = vcmp.lt.f32.partialorder %v4035_v46, %v4036_v3  ;;  %v4039_v23 = vld [vmem:[#allocation14_spill] sm:$0xff] }
 0x25d   :  { %v1392_v29 = vadd.s32 %v1391_v18, %v1389_v38  ;;  %v1376_v2 = vadd.s32 %v1375_v6, %v1373_v8  ;;  %v1406_v38 = vcvt.f32.s32 %v3444_v24  ;;  %vm4040_vm0 = vcmp.lt.f32.partialorder %v4038_v33, %v4039_v23  ;;  %v1569_v6 = vld [vmem:[#allocation3 + $0xf0] sm:$0xff] }
 0x25e   :  { %v1583_v25 = vsel %vm4025_vm10, %v1136_v17, %v1551_v48  ;;  %v1568_v17 = vld [vmem:[#allocation3 + $0xe8] sm:$0xff] }
 0x25f   :  { %v1745_v19 = vld [vmem:[#allocation3 + $0x50] sm:$0xff]  ;;  %v1599_v15 = vsel %vm4022_vm7, %v1392_v29, %v1567_v39  ;;  %v1598_v35 = vsel %vm4028_vm14, %v1376_v2, %v1566_v5  ;;  %1616 = vst.msk [vmem:[#allocation3 + $0x60] sm:$0xff] %vm21_vm12, %v1583_v25  ;;  %v1407_v8 = vshll.u32 %v1406_v38, 16 }
 0x260   :  { %1777 = vst.msk [vmem:[%s3756_s4 + $0x50] sm:$0xff] %vm21_vm12, %v1745_v19  ;;  %v1183_v19 = vshll.u32 %v1182_v51, 16 }
 0x261   :  { %1632 = vst.msk [vmem:[#allocation3 + $0xe0] sm:$0xff] %vm21_vm12, %v1599_v15  ;;  %v1746_v47 = vld [vmem:[#allocation3 + $0x58] sm:$0xff] }
 0x262   :  { %1778 = vst.msk [vmem:[%s3756_s4 + $0x58] sm:$0xff] %vm21_vm12, %v1746_v47  ;;  %v1148_v16 = vpop.xlane.xlu0 %1147 }
 0x263   :  { %1631 = vst.msk [vmem:[#allocation3 + $0xd8] sm:$0xff] %vm21_vm12, %v1598_v35  ;;  %v1149_v14 = vcvt.f32.s32 %v1148_v16 }
 0x265   :  { %v1152_v11 = vadd.s32 %v1151_v44, %v1149_v14 }
 0x266   :  { %v1747_v21 = vld [vmem:[#allocation3 + $0x60] sm:$0xff]  ;;  %v1164_v26 = vpop.xlane.xlu2 %1163 }
 0x267   :  { %v1584_v30 = vsel %vm4031_vm6, %v1152_v11, %v1552_v54  ;;  %1779 = vst.msk [vmem:[%s3756_s4 + $0x60] sm:$0xff] %vm21_vm12, %v1747_v21  ;;  %v1165_v59 = vcvt.f32.s32 %v1164_v26 }
 0x268   :  { %v1763_v60 = vld [vmem:[#allocation3 + $0xe0] sm:$0xff]  ;;  %1617 = vst.msk [vmem:[#allocation3 + $0x68] sm:$0xff] %vm21_vm12, %v1584_v30 }
 0x269   :  { %1795 = vst.msk [vmem:[%s3756_s4 + $0xe0] sm:$0xff] %vm21_vm12, %v1763_v60  ;;  %v1168_v45 = vadd.s32 %v1167_v37, %v1165_v59 }
 0x26a   :  { %v1762_v56 = vld [vmem:[#allocation3 + $0xd8] sm:$0xff] }
 0x26b   :  { %1794 = vst.msk [vmem:[%s3756_s4 + $0xd8] sm:$0xff] %vm21_vm12, %v1762_v56  ;;  %v1585_v55 = vsel %vm4034_vm15, %v1168_v45, %v1553_v20 }
 0x26c   :  { %1618 = vst.msk [vmem:[#allocation3 + $0x70] sm:$0xff] %vm21_vm12, %v1585_v55 }
 0x26f   :  { %v1748_v10 = vld [vmem:[#allocation3 + $0x68] sm:$0xff] }
 0x270   :  { %1780 = vst.msk [vmem:[%s3756_s4 + $0x68] sm:$0xff] %vm21_vm12, %v1748_v10 }
 0x271   :  { %v1436_v52 = vpop.xlane.xlu0 %1435 }
 0x272   :  { %v1437_v41 = vcvt.f32.s32 %v1436_v52  ;;  %v1180_v36 = vpop.xlane.xlu1 %1179 }
 0x273   :  { %v1181_v42 = vcvt.f32.s32 %v1180_v36  ;;  %v1749_v28 = vld [vmem:[#allocation3 + $0x70] sm:$0xff] }
 0x274   :  { %v1440_v40 = vadd.s32 %v1439_v13, %v1437_v41  ;;  %1781 = vst.msk [vmem:[%s3756_s4 + $0x70] sm:$0xff] %vm21_vm12, %v1749_v28 }
 0x275   :  { %v1184_v62 = vadd.s32 %v1183_v19, %v1181_v42 }
 0x276   :  { %v1602_v18 = vsel %vm4037_vm3, %v1440_v40, %v1570_v12  ;;  %v1420_v61 = vpop.xlane.xlu2 %1419 }
 0x277   :  { %1635 = vst.msk [vmem:[#allocation3 + $0xf8] sm:$0xff] %vm21_vm12, %v1602_v18  ;;  %v1586_v39 = vsel %vm4040_vm0, %v1184_v62, %v1554_v27  ;;  %v1421_v7 = vcvt.f32.s32 %v1420_v61 }
 0x278   :  { %1619 = vst.msk [vmem:[#allocation3 + $0x78] sm:$0xff] %vm21_vm12, %v1586_v39 }
 0x279   :  { %v1424_v48 = vadd.s32 %v1423_v22, %v1421_v7 }
 0x27a   :  { %v1404_v29 = vpop.xlane.xlu1 %1403 }
 0x27b   :  { %v1405_v5 = vcvt.f32.s32 %v1404_v29  ;;  %v1601_v24 = vsel %vm4043_vm2, %v1424_v48, %v1569_v6 }
 0x27c   :  { %1634 = vst.msk [vmem:[#allocation3 + $0xf0] sm:$0xff] %vm21_vm12, %v1601_v24 }
 0x27d   :  { %v1408_v34 = vadd.s32 %v1407_v8, %v1405_v5 }
 0x27e   :  { %v1766_v15 = vld [vmem:[#allocation3 + $0xf8] sm:$0xff] }
 0x27f   :  { %1798 = vst.msk [vmem:[%s3756_s4 + $0xf8] sm:$0xff] %vm21_vm12, %v1766_v15  ;;  %v1750_v2 = vld [vmem:[#allocation3 + $0x78] sm:$0xff]  ;;  %v1600_v25 = vsel %vm4046_vm5, %v1408_v34, %v1568_v17 }
 0x280   :  { %1782 = vst.msk [vmem:[%s3756_s4 + $0x78] sm:$0xff] %vm21_vm12, %v1750_v2 }
 0x281   :  { %1633 = vst.msk [vmem:[#allocation3 + $0xe8] sm:$0xff] %vm21_vm12, %v1600_v25 }
 0x283   :  { %v1765_v47 = vld [vmem:[#allocation3 + $0xf0] sm:$0xff] }
 0x284   :  { %1797 = vst.msk [vmem:[%s3756_s4 + $0xf0] sm:$0xff] %vm21_vm12, %v1765_v47 }
 0x288   :  { %v1764_v43 = vld [vmem:[#allocation3 + $0xe8] sm:$0xff] }
 0x289   :  { %1796 = vst.msk [vmem:[%s3756_s4 + $0xe8] sm:$0xff] %vm21_vm12, %v1764_v43 }

</bundles_post_ra>
